<compile_context>
chip_gen: v5e
topology: v5e:2x2
jax: 0.10.0
libtpu: 0.0.40
codegen_flags: <defaults>
</compile_context>

<pallas_src>
import numpy as np
import jax
import jax.numpy as jnp
from jax import lax
from jax.experimental import pallas as pl
from jax.experimental.pallas import tpu as pltpu

EPS = 1e-5  # PyTorch BatchNorm1d default


def _pick_groups(J):
    """Smallest group count >= 2 that divides J (keeps v7x megacore fed); else 1."""
    for G in (2, 3):
        if J % G == 0:
            return G
    return 1


# ---------------------------------------------------------------------------
# Pallas kernel factory: one grid step processes Jg consecutive resolution levels.
# ---------------------------------------------------------------------------
def make_wavelet_bn_kernel(B, C, W, J, G, Jg, Lmax):
    BC = B * C

    def kernel(x_ref, gamma_ref, beta_ref, inp_ref, tgt_ref):
        # x_ref:     (BC, W)        resident across all groups (read-only)
        # gamma_ref: (J, 1, C, 1)   resident BatchNorm weights
        # beta_ref:  (J, 1, C, 1)   resident BatchNorm biases
        # inp_ref:   (Jg, BC, W)    normalized masked-input reconstructions (this group)
        # tgt_ref:   (Jg, BC, W)    masked-target reconstructions (this group)
        x2d = x_ref[...]  # (BC, W) f32

        # Same-block test built once: row//s == col//s  <=>  (row ^ col) < s   (s = 2**k).
        rowi = lax.broadcasted_iota(jnp.int32, (W, W), 0)
        coli = lax.broadcasted_iota(jnp.int32, (W, W), 1)
        xor_d = rowi ^ coli  # (W, W) int32, built once, reused for every level

        def block_avg_op(s):
            # (W, W) operator: y = x @ A_s  gives the block average with block size s.
            return jnp.where(xor_d < s, jnp.float32(1.0 / s), jnp.float32(0.0))

        def emit_group(gg):
            t_prev = None  # T_{j-1}, carried across consecutive levels of this group
            for l in range(Jg):
                j = gg * Jg + l
                s = 1 << (Lmax - j)
                t = jnp.dot(x2d, block_avg_op(s),
                            preferred_element_type=jnp.float32)       # T_j
                if j == 0:
                    p = t                                              # P_0 = T_0
                else:
                    if t_prev is None:  # group boundary: recompute T_{j-1} once
                        t_prev = jnp.dot(x2d, block_avg_op(2 * s),
                                         preferred_element_type=jnp.float32)
                    p = t - t_prev                                     # P_j = T_j - T_{j-1}

                # BatchNorm1d (training mode): per-channel stats over (batch, length),
                # centered two-pass (biased) variance.
                y3 = p.reshape(B, C, W)
                mean = jnp.mean(y3, axis=(0, 2), keepdims=True)                 # (1, C, 1)
                var = jnp.mean((y3 - mean) ** 2, axis=(0, 2), keepdims=True)    # (1, C, 1)
                scale = gamma_ref[j] * lax.rsqrt(var + EPS)                     # (1, C, 1)
                shift = beta_ref[j] - mean * scale

                inp_ref[l] = (y3 * scale + shift).reshape(BC, W)   # lane-dense row store
                tgt_ref[l] = t                                     # direct store, no reshape
                t_prev = t

        g = pl.program_id(0)
        for gg in range(G):           # G is tiny (1-3); one statically-specialized branch per group
            @pl.when(g == gg)
            def _(gg=gg):
                emit_group(gg)

    return kernel


# ---------------------------------------------------------------------------
# Wrapper (WaveletBase.forward equivalent).
# ---------------------------------------------------------------------------
def wavelet_base_forward(x, gamma, beta):
    """x: (B, C, W) with W a power of two; gamma/beta: (J, C) BatchNorm affine params.
    Returns (masked_inputs, masked_targets), each (J, B, C, W) — entry j matches the
    j-th list element of the PyTorch forward (batch_norm=True, training mode)."""
    B, C, W = x.shape
    Lmax = int(np.log2(W))
    assert (1 << Lmax) == W, "input_size must be a power of two"
    J = Lmax + 1  # recursion_limit=None
    assert gamma.shape == (J, C) and beta.shape == (J, C)

    G = _pick_groups(J)
    Jg = J // G
    BC = B * C

    x2d = x.reshape(BC, W).astype(jnp.float32)
    gamma_r = gamma.reshape(J, 1, C, 1).astype(jnp.float32)
    beta_r = beta.reshape(J, 1, C, 1).astype(jnp.float32)

    kernel = make_wavelet_bn_kernel(B, C, W, J, G, Jg, Lmax)

    out_shape = (
        jax.ShapeDtypeStruct((J, BC, W), jnp.float32),
        jax.ShapeDtypeStruct((J, BC, W), jnp.float32),
    )

    inp_flat, tgt_flat = pl.pallas_call(
        kernel,
        out_shape=out_shape,
        grid_spec=pltpu.PrefetchScalarGridSpec(
            num_scalar_prefetch=0,
            grid=(G,),
            in_specs=[
                pl.BlockSpec((BC, W), lambda g: (0, 0)),            # x resident
                pl.BlockSpec((J, 1, C, 1), lambda g: (0, 0, 0, 0)),  # gamma resident
                pl.BlockSpec((J, 1, C, 1), lambda g: (0, 0, 0, 0)),  # beta resident
            ],
            out_specs=[
                pl.BlockSpec((Jg, BC, W), lambda g: (g, 0, 0)),
                pl.BlockSpec((Jg, BC, W), lambda g: (g, 0, 0)),
            ],
        ),
        compiler_params=pltpu.CompilerParams(
            # Level groups are independent -> shard across v7x TensorCores.
            dimension_semantics=("parallel",),
            vmem_limit_bytes=32 * 1024 * 1024,
        ),
    )(x2d, gamma_r, beta_r)

    # Layout-preserving reshapes back to the PyTorch (J, B, C, W) layout.
    return inp_flat.reshape(J, B, C, W), tgt_flat.reshape(J, B, C, W)


# ---------------------------------------------------------------------------
# Self-test: float64 NumPy reference of the same math (projection matrices +
# training-mode BatchNorm with non-trivial gamma/beta).
# ---------------------------------------------------------------------------
def _reference(x_np, W, gamma, beta):
    Lmax = int(np.log2(W))
    J = Lmax + 1

    def block_avg(L):
        s = 2 ** L
        A = np.zeros((W, W), dtype=np.float64)
        for p in range(W):
            blk = p // s
            A[p, blk * s:(blk + 1) * s] = 1.0 / s
        return A

    A = [block_avg(L) for L in range(Lmax + 1)]
    pmats = [A[Lmax]] + [A[Lmax - j] - A[Lmax - j + 1] for j in range(1, J)]
    tmats = [A[Lmax - j] for j in range(J)]
    pmats, tmats = np.stack(pmats), np.stack(tmats)

    y = np.einsum('bcw,jwv->jbcv', x_np, pmats)
    t = np.einsum('bcw,jwv->jbcv', x_np, tmats)
    mean = y.mean(axis=(1, 3), keepdims=True)
    var = ((y - mean) ** 2).mean(axis=(1, 3), keepdims=True)
    gm = gamma[:, None, :, None]
    bt = beta[:, None, :, None]
    return (y - mean) / np.sqrt(var + EPS) * gm + bt, t


def _run_case(key, B, C, W):
    Lmax = int(np.log2(W))
    J = Lmax + 1
    k1, k2, k3 = jax.random.split(key, 3)
    x = jax.random.normal(k1, (B, C, W), dtype=jnp.float32)
    # Non-trivial BatchNorm affine params (PyTorch default weight=1/bias=0 is a special case).
    gamma = 0.5 + jax.random.uniform(k2, (J, C), dtype=jnp.float32)
    beta = 0.1 * jax.random.normal(k3, (J, C), dtype=jnp.float32)

    fwd = jax.jit(wavelet_base_forward)
    masked_inputs, masked_targets = fwd(x, gamma, beta)
    jax.block_until_ready((masked_inputs, masked_targets))

    assert masked_inputs.shape == (J, B, C, W)
    assert masked_targets.shape == (J, B, C, W)

    y_ref, t_ref = _reference(np.asarray(x, np.float64), W,
                              np.asarray(gamma, np.float64),
                              np.asarray(beta, np.float64))
    np.testing.assert_allclose(np.asarray(masked_inputs), y_ref, rtol=1e-3, atol=1e-3)
    np.testing.assert_allclose(np.asarray(masked_targets), t_ref, rtol=1e-3, atol=1e-3)


if __name__ == "__main__":
    key = jax.random.PRNGKey(0)
    k_a, k_b = jax.random.split(key)
    # Primary case: batch=2, channels=4, input_size=128 -> J=8 levels, G=2 groups.
    _run_case(k_a, B=2, C=4, W=128)
    # Second shape: J=9 levels -> G=3 groups, odd channel count, W=256.
    _run_case(k_b, B=3, C=5, W=256)
    print("KERNEL_OK")
</pallas_src>

<mosaic_0001>
module attributes {stable_mosaic.version = 11 : i64} {
  func.func @kernel(%arg0: i32, %arg1: memref<8x128xf32, #tpu.memory_space<vmem>>, %arg2: memref<8x1x4x1xf32, #tpu.memory_space<vmem>>, %arg3: memref<8x1x4x1xf32, #tpu.memory_space<vmem>>, %arg4: memref<4x8x128xf32, #tpu.memory_space<vmem>>, %arg5: memref<4x8x128xf32, #tpu.memory_space<vmem>>) attributes {dimension_semantics = [#tpu.dimension_semantics<parallel>], iteration_bounds = array<i64: 2>, scalar_prefetch = 0 : i64, scratch_operands = 0 : i64, tpu.core_type = #tpu.core_type<tc>, window_params = [{pipeline_mode = #tpu.pipeline_mode<synchronous>, transform_indices = @transform_0, window_bounds = array<i64: 8, 128>}, {pipeline_mode = #tpu.pipeline_mode<synchronous>, transform_indices = @transform_1, window_bounds = array<i64: 8, 1, 4, 1>}, {pipeline_mode = #tpu.pipeline_mode<synchronous>, transform_indices = @transform_2, window_bounds = array<i64: 8, 1, 4, 1>}, {transform_indices = @transform_3, window_bounds = array<i64: 4, 8, 128>}, {transform_indices = @transform_4, window_bounds = array<i64: 4, 8, 128>}]} {
    %c0 = arith.constant 0 : index
    %c0_0 = arith.constant 0 : index
    %0 = vector.load %arg1[%c0, %c0_0] : memref<8x128xf32, #tpu.memory_space<vmem>>, vector<8x128xf32>
    %1 = tpu.iota {dimensions = array<i32: 0>} : vector<128x128xi32>
    %2 = tpu.iota {dimensions = array<i32: 1>} : vector<128x128xi32>
    %3 = arith.xori %1, %2 : vector<128x128xi32>
    %c0_i32 = arith.constant 0 : i32
    %4 = arith.cmpi eq, %arg0, %c0_i32 : i32
    %5 = arith.extui %4 : i1 to i32
    %c0_i32_1 = arith.constant 0 : i32
    %6 = arith.cmpi ne, %5, %c0_i32_1 : i32
    scf.if %6 {
      %c128_i32 = arith.constant 128 : i32
      %10 = vector.broadcast %c128_i32 : i32 to vector<128x128xi32>
      %11 = arith.cmpi slt, %3, %10 : vector<128x128xi32>
      %cst = arith.constant 7.812500e-03 : f32
      %cst_3 = arith.constant 0.000000e+00 : f32
      %12 = vector.broadcast %cst : f32 to vector<128x128xf32>
      %13 = vector.broadcast %cst_3 : f32 to vector<128x128xf32>
      %14 = arith.select %11, %12, %13 : vector<128x128xi1>, vector<128x128xf32>
      %cst_4 = arith.constant dense<0.000000e+00> : vector<8x128xf32>
      %15 = tpu.matmul %0, %14, %cst_4 {dimension_numbers = #tpu.dot_dimension_numbers<[1], [0], [0], [1], [0, 0, 1, 1], [], []>} : vector<8x128xf32>, vector<128x128xf32>, vector<8x128xf32> -> vector<8x128xf32>
      %16 = vector.shape_cast %15 : vector<8x128xf32> to vector<2x4x128xf32>
      %cst_5 = arith.constant dense<0.000000e+00> : vector<4xf32>
      %17 = vector.multi_reduction <add>, %16, %cst_5 [0, 2] : vector<2x4x128xf32> to vector<4xf32>
      %18 = vector.shape_cast %17 : vector<4xf32> to vector<1x4x1xf32>
      %cst_6 = arith.constant 2.560000e+02 : f32
      %19 = vector.broadcast %cst_6 : f32 to vector<1x4x1xf32>
      %20 = arith.divf %18, %19 : vector<1x4x1xf32>
      %21 = vector.broadcast %20 : vector<1x4x1xf32> to vector<2x4x128xf32>
      %22 = arith.subf %16, %21 : vector<2x4x128xf32>
      %23 = arith.mulf %22, %22 : vector<2x4x128xf32>
      %cst_7 = arith.constant dense<0.000000e+00> : vector<4xf32>
      %24 = vector.multi_reduction <add>, %23, %cst_7 [0, 2] : vector<2x4x128xf32> to vector<4xf32>
      %25 = vector.shape_cast %24 : vector<4xf32> to vector<1x4x1xf32>
      %cst_8 = arith.constant 2.560000e+02 : f32
      %26 = vector.broadcast %cst_8 : f32 to vector<1x4x1xf32>
      %27 = arith.divf %25, %26 : vector<1x4x1xf32>
      %c0_9 = arith.constant 0 : index
      %c0_10 = arith.constant 0 : index
      %c0_11 = arith.constant 0 : index
      %c0_12 = arith.constant 0 : index
      %28 = vector.load %arg2[%c0_9, %c0_10, %c0_11, %c0_12] : memref<8x1x4x1xf32, #tpu.memory_space<vmem>>, vector<1x1x4x1xf32>
      %29 = vector.shape_cast %28 : vector<1x1x4x1xf32> to vector<1x4x1xf32>
      %cst_13 = arith.constant 9.99999974E-6 : f32
      %30 = vector.broadcast %cst_13 : f32 to vector<1x4x1xf32>
      %31 = arith.addf %27, %30 : vector<1x4x1xf32>
      %32 = math.rsqrt %31 : vector<1x4x1xf32>
      %33 = arith.mulf %29, %32 : vector<1x4x1xf32>
      %c0_14 = arith.constant 0 : index
      %c0_15 = arith.constant 0 : index
      %c0_16 = arith.constant 0 : index
      %c0_17 = arith.constant 0 : index
      %34 = vector.load %arg3[%c0_14, %c0_15, %c0_16, %c0_17] : memref<8x1x4x1xf32, #tpu.memory_space<vmem>>, vector<1x1x4x1xf32>
      %35 = vector.shape_cast %34 : vector<1x1x4x1xf32> to vector<1x4x1xf32>
      %36 = arith.mulf %20, %33 : vector<1x4x1xf32>
      %37 = arith.subf %35, %36 : vector<1x4x1xf32>
      %38 = vector.broadcast %33 : vector<1x4x1xf32> to vector<2x4x128xf32>
      %39 = arith.mulf %16, %38 : vector<2x4x128xf32>
      %40 = vector.broadcast %37 : vector<1x4x1xf32> to vector<2x4x128xf32>
      %41 = arith.addf %39, %40 : vector<2x4x128xf32>
      %42 = vector.shape_cast %41 : vector<2x4x128xf32> to vector<8x128xf32>
      %c0_18 = arith.constant 0 : index
      %c0_19 = arith.constant 0 : index
      %c0_20 = arith.constant 0 : index
      %43 = vector.load %arg4[%c0_18, %c0_19, %c0_20] : memref<4x8x128xf32, #tpu.memory_space<vmem>>, vector<1x8x128xf32>
      %44 = vector.shape_cast %43 : vector<1x8x128xf32> to vector<8x128xf32>
      %45 = vector.shape_cast %42 : vector<8x128xf32> to vector<1x8x128xf32>
      tpu.vector_store %arg4[%c0_18, %c0_19, %c0_20], %45 {strides = array<i32>} : memref<4x8x128xf32, #tpu.memory_space<vmem>>, vector<1x8x128xf32>,
      %c0_21 = arith.constant 0 : index
      %c0_22 = arith.constant 0 : index
      %c0_23 = arith.constant 0 : index
      %46 = vector.load %arg5[%c0_21, %c0_22, %c0_23] : memref<4x8x128xf32, #tpu.memory_space<vmem>>, vector<1x8x128xf32>
      %47 = vector.shape_cast %46 : vector<1x8x128xf32> to vector<8x128xf32>
      %48 = vector.shape_cast %15 : vector<8x128xf32> to vector<1x8x128xf32>
      tpu.vector_store %arg5[%c0_21, %c0_22, %c0_23], %48 {strides = array<i32>} : memref<4x8x128xf32, #tpu.memory_space<vmem>>, vector<1x8x128xf32>,
      %c64_i32 = arith.constant 64 : i32
      %49 = vector.broadcast %c64_i32 : i32 to vector<128x128xi32>
      %50 = arith.cmpi slt, %3, %49 : vector<128x128xi32>
      %cst_24 = arith.constant 1.562500e-02 : f32
      %cst_25 = arith.constant 0.000000e+00 : f32
      %51 = vector.broadcast %cst_24 : f32 to vector<128x128xf32>
      %52 = vector.broadcast %cst_25 : f32 to vector<128x128xf32>
      %53 = arith.select %50, %51, %52 : vector<128x128xi1>, vector<128x128xf32>
      %cst_26 = arith.constant dense<0.000000e+00> : vector<8x128xf32>
      %54 = tpu.matmul %0, %53, %cst_26 {dimension_numbers = #tpu.dot_dimension_numbers<[1], [0], [0], [1], [0, 0, 1, 1], [], []>} : vector<8x128xf32>, vector<128x128xf32>, vector<8x128xf32> -> vector<8x128xf32>
      %55 = arith.subf %54, %15 : vector<8x128xf32>
      %56 = vector.shape_cast %55 : vector<8x128xf32> to vector<2x4x128xf32>
      %cst_27 = arith.constant dense<0.000000e+00> : vector<4xf32>
      %57 = vector.multi_reduction <add>, %56, %cst_27 [0, 2] : vector<2x4x128xf32> to vector<4xf32>
      %58 = vector.shape_cast %57 : vector<4xf32> to vector<1x4x1xf32>
      %cst_28 = arith.constant 2.560000e+02 : f32
      %59 = vector.broadcast %cst_28 : f32 to vector<1x4x1xf32>
      %60 = arith.divf %58, %59 : vector<1x4x1xf32>
      %61 = vector.broadcast %60 : vector<1x4x1xf32> to vector<2x4x128xf32>
      %62 = arith.subf %56, %61 : vector<2x4x128xf32>
      %63 = arith.mulf %62, %62 : vector<2x4x128xf32>
      %cst_29 = arith.constant dense<0.000000e+00> : vector<4xf32>
      %64 = vector.multi_reduction <add>, %63, %cst_29 [0, 2] : vector<2x4x128xf32> to vector<4xf32>
      %65 = vector.shape_cast %64 : vector<4xf32> to vector<1x4x1xf32>
      %cst_30 = arith.constant 2.560000e+02 : f32
      %66 = vector.broadcast %cst_30 : f32 to vector<1x4x1xf32>
      %67 = arith.divf %65, %66 : vector<1x4x1xf32>
      %c1 = arith.constant 1 : index
      %c0_31 = arith.constant 0 : index
      %c0_32 = arith.constant 0 : index
      %c0_33 = arith.constant 0 : index
      %68 = vector.load %arg2[%c1, %c0_31, %c0_32, %c0_33] : memref<8x1x4x1xf32, #tpu.memory_space<vmem>>, vector<1x1x4x1xf32>
      %69 = vector.shape_cast %68 : vector<1x1x4x1xf32> to vector<1x4x1xf32>
      %cst_34 = arith.constant 9.99999974E-6 : f32
      %70 = vector.broadcast %cst_34 : f32 to vector<1x4x1xf32>
      %71 = arith.addf %67, %70 : vector<1x4x1xf32>
      %72 = math.rsqrt %71 : vector<1x4x1xf32>
      %73 = arith.mulf %69, %72 : vector<1x4x1xf32>
      %c1_35 = arith.constant 1 : index
      %c0_36 = arith.constant 0 : index
      %c0_37 = arith.constant 0 : index
      %c0_38 = arith.constant 0 : index
      %74 = vector.load %arg3[%c1_35, %c0_36, %c0_37, %c0_38] : memref<8x1x4x1xf32, #tpu.memory_space<vmem>>, vector<1x1x4x1xf32>
      %75 = vector.shape_cast %74 : vector<1x1x4x1xf32> to vector<1x4x1xf32>
      %76 = arith.mulf %60, %73 : vector<1x4x1xf32>
      %77 = arith.subf %75, %76 : vector<1x4x1xf32>
      %78 = vector.broadcast %73 : vector<1x4x1xf32> to vector<2x4x128xf32>
      %79 = arith.mulf %56, %78 : vector<2x4x128xf32>
      %80 = vector.broadcast %77 : vector<1x4x1xf32> to vector<2x4x128xf32>
      %81 = arith.addf %79, %80 : vector<2x4x128xf32>
      %82 = vector.shape_cast %81 : vector<2x4x128xf32> to vector<8x128xf32>
      %c1_39 = arith.constant 1 : index
      %c0_40 = arith.constant 0 : index
      %c0_41 = arith.constant 0 : index
      %83 = vector.load %arg4[%c1_39, %c0_40, %c0_41] : memref<4x8x128xf32, #tpu.memory_space<vmem>>, vector<1x8x128xf32>
      %84 = vector.shape_cast %83 : vector<1x8x128xf32> to vector<8x128xf32>
      %85 = vector.shape_cast %82 : vector<8x128xf32> to vector<1x8x128xf32>
      tpu.vector_store %arg4[%c1_39, %c0_40, %c0_41], %85 {strides = array<i32>} : memref<4x8x128xf32, #tpu.memory_space<vmem>>, vector<1x8x128xf32>,
      %c1_42 = arith.constant 1 : index
      %c0_43 = arith.constant 0 : index
      %c0_44 = arith.constant 0 : index
      %86 = vector.load %arg5[%c1_42, %c0_43, %c0_44] : memref<4x8x128xf32, #tpu.memory_space<vmem>>, vector<1x8x128xf32>
      %87 = vector.shape_cast %86 : vector<1x8x128xf32> to vector<8x128xf32>
      %88 = vector.shape_cast %54 : vector<8x128xf32> to vector<1x8x128xf32>
      tpu.vector_store %arg5[%c1_42, %c0_43, %c0_44], %88 {strides = array<i32>} : memref<4x8x128xf32, #tpu.memory_space<vmem>>, vector<1x8x128xf32>,
      %c32_i32 = arith.constant 32 : i32
      %89 = vector.broadcast %c32_i32 : i32 to vector<128x128xi32>
      %90 = arith.cmpi slt, %3, %89 : vector<128x128xi32>
      %cst_45 = arith.constant 3.125000e-02 : f32
      %cst_46 = arith.constant 0.000000e+00 : f32
      %91 = vector.broadcast %cst_45 : f32 to vector<128x128xf32>
      %92 = vector.broadcast %cst_46 : f32 to vector<128x128xf32>
      %93 = arith.select %90, %91, %92 : vector<128x128xi1>, vector<128x128xf32>
      %cst_47 = arith.constant dense<0.000000e+00> : vector<8x128xf32>
      %94 = tpu.matmul %0, %93, %cst_47 {dimension_numbers = #tpu.dot_dimension_numbers<[1], [0], [0], [1], [0, 0, 1, 1], [], []>} : vector<8x128xf32>, vector<128x128xf32>, vector<8x128xf32> -> vector<8x128xf32>
      %95 = arith.subf %94, %54 : vector<8x128xf32>
      %96 = vector.shape_cast %95 : vector<8x128xf32> to vector<2x4x128xf32>
      %cst_48 = arith.constant dense<0.000000e+00> : vector<4xf32>
      %97 = vector.multi_reduction <add>, %96, %cst_48 [0, 2] : vector<2x4x128xf32> to vector<4xf32>
      %98 = vector.shape_cast %97 : vector<4xf32> to vector<1x4x1xf32>
      %cst_49 = arith.constant 2.560000e+02 : f32
      %99 = vector.broadcast %cst_49 : f32 to vector<1x4x1xf32>
      %100 = arith.divf %98, %99 : vector<1x4x1xf32>
      %101 = vector.broadcast %100 : vector<1x4x1xf32> to vector<2x4x128xf32>
      %102 = arith.subf %96, %101 : vector<2x4x128xf32>
      %103 = arith.mulf %102, %102 : vector<2x4x128xf32>
      %cst_50 = arith.constant dense<0.000000e+00> : vector<4xf32>
      %104 = vector.multi_reduction <add>, %103, %cst_50 [0, 2] : vector<2x4x128xf32> to vector<4xf32>
      %105 = vector.shape_cast %104 : vector<4xf32> to vector<1x4x1xf32>
      %cst_51 = arith.constant 2.560000e+02 : f32
      %106 = vector.broadcast %cst_51 : f32 to vector<1x4x1xf32>
      %107 = arith.divf %105, %106 : vector<1x4x1xf32>
      %c2 = arith.constant 2 : index
      %c0_52 = arith.constant 0 : index
      %c0_53 = arith.constant 0 : index
      %c0_54 = arith.constant 0 : index
      %108 = vector.load %arg2[%c2, %c0_52, %c0_53, %c0_54] : memref<8x1x4x1xf32, #tpu.memory_space<vmem>>, vector<1x1x4x1xf32>
      %109 = vector.shape_cast %108 : vector<1x1x4x1xf32> to vector<1x4x1xf32>
      %cst_55 = arith.constant 9.99999974E-6 : f32
      %110 = vector.broadcast %cst_55 : f32 to vector<1x4x1xf32>
      %111 = arith.addf %107, %110 : vector<1x4x1xf32>
      %112 = math.rsqrt %111 : vector<1x4x1xf32>
      %113 = arith.mulf %109, %112 : vector<1x4x1xf32>
      %c2_56 = arith.constant 2 : index
      %c0_57 = arith.constant 0 : index
      %c0_58 = arith.constant 0 : index
      %c0_59 = arith.constant 0 : index
      %114 = vector.load %arg3[%c2_56, %c0_57, %c0_58, %c0_59] : memref<8x1x4x1xf32, #tpu.memory_space<vmem>>, vector<1x1x4x1xf32>
      %115 = vector.shape_cast %114 : vector<1x1x4x1xf32> to vector<1x4x1xf32>
      %116 = arith.mulf %100, %113 : vector<1x4x1xf32>
      %117 = arith.subf %115, %116 : vector<1x4x1xf32>
      %118 = vector.broadcast %113 : vector<1x4x1xf32> to vector<2x4x128xf32>
      %119 = arith.mulf %96, %118 : vector<2x4x128xf32>
      %120 = vector.broadcast %117 : vector<1x4x1xf32> to vector<2x4x128xf32>
      %121 = arith.addf %119, %120 : vector<2x4x128xf32>
      %122 = vector.shape_cast %121 : vector<2x4x128xf32> to vector<8x128xf32>
      %c2_60 = arith.constant 2 : index
      %c0_61 = arith.constant 0 : index
      %c0_62 = arith.constant 0 : index
      %123 = vector.load %arg4[%c2_60, %c0_61, %c0_62] : memref<4x8x128xf32, #tpu.memory_space<vmem>>, vector<1x8x128xf32>
      %124 = vector.shape_cast %123 : vector<1x8x128xf32> to vector<8x128xf32>
      %125 = vector.shape_cast %122 : vector<8x128xf32> to vector<1x8x128xf32>
      tpu.vector_store %arg4[%c2_60, %c0_61, %c0_62], %125 {strides = array<i32>} : memref<4x8x128xf32, #tpu.memory_space<vmem>>, vector<1x8x128xf32>,
      %c2_63 = arith.constant 2 : index
      %c0_64 = arith.constant 0 : index
      %c0_65 = arith.constant 0 : index
      %126 = vector.load %arg5[%c2_63, %c0_64, %c0_65] : memref<4x8x128xf32, #tpu.memory_space<vmem>>, vector<1x8x128xf32>
      %127 = vector.shape_cast %126 : vector<1x8x128xf32> to vector<8x128xf32>
      %128 = vector.shape_cast %94 : vector<8x128xf32> to vector<1x8x128xf32>
      tpu.vector_store %arg5[%c2_63, %c0_64, %c0_65], %128 {strides = array<i32>} : memref<4x8x128xf32, #tpu.memory_space<vmem>>, vector<1x8x128xf32>,
      %c16_i32 = arith.constant 16 : i32
      %129 = vector.broadcast %c16_i32 : i32 to vector<128x128xi32>
      %130 = arith.cmpi slt, %3, %129 : vector<128x128xi32>
      %cst_66 = arith.constant 6.250000e-02 : f32
      %cst_67 = arith.constant 0.000000e+00 : f32
      %131 = vector.broadcast %cst_66 : f32 to vector<128x128xf32>
      %132 = vector.broadcast %cst_67 : f32 to vector<128x128xf32>
      %133 = arith.select %130, %131, %132 : vector<128x128xi1>, vector<128x128xf32>
      %cst_68 = arith.constant dense<0.000000e+00> : vector<8x128xf32>
      %134 = tpu.matmul %0, %133, %cst_68 {dimension_numbers = #tpu.dot_dimension_numbers<[1], [0], [0], [1], [0, 0, 1, 1], [], []>} : vector<8x128xf32>, vector<128x128xf32>, vector<8x128xf32> -> vector<8x128xf32>
      %135 = arith.subf %134, %94 : vector<8x128xf32>
      %136 = vector.shape_cast %135 : vector<8x128xf32> to vector<2x4x128xf32>
      %cst_69 = arith.constant dense<0.000000e+00> : vector<4xf32>
      %137 = vector.multi_reduction <add>, %136, %cst_69 [0, 2] : vector<2x4x128xf32> to vector<4xf32>
      %138 = vector.shape_cast %137 : vector<4xf32> to vector<1x4x1xf32>
      %cst_70 = arith.constant 2.560000e+02 : f32
      %139 = vector.broadcast %cst_70 : f32 to vector<1x4x1xf32>
      %140 = arith.divf %138, %139 : vector<1x4x1xf32>
      %141 = vector.broadcast %140 : vector<1x4x1xf32> to vector<2x4x128xf32>
      %142 = arith.subf %136, %141 : vector<2x4x128xf32>
      %143 = arith.mulf %142, %142 : vector<2x4x128xf32>
      %cst_71 = arith.constant dense<0.000000e+00> : vector<4xf32>
      %144 = vector.multi_reduction <add>, %143, %cst_71 [0, 2] : vector<2x4x128xf32> to vector<4xf32>
      %145 = vector.shape_cast %144 : vector<4xf32> to vector<1x4x1xf32>
      %cst_72 = arith.constant 2.560000e+02 : f32
      %146 = vector.broadcast %cst_72 : f32 to vector<1x4x1xf32>
      %147 = arith.divf %145, %146 : vector<1x4x1xf32>
      %c3 = arith.constant 3 : index
      %c0_73 = arith.constant 0 : index
      %c0_74 = arith.constant 0 : index
      %c0_75 = arith.constant 0 : index
      %148 = vector.load %arg2[%c3, %c0_73, %c0_74, %c0_75] : memref<8x1x4x1xf32, #tpu.memory_space<vmem>>, vector<1x1x4x1xf32>
      %149 = vector.shape_cast %148 : vector<1x1x4x1xf32> to vector<1x4x1xf32>
      %cst_76 = arith.constant 9.99999974E-6 : f32
      %150 = vector.broadcast %cst_76 : f32 to vector<1x4x1xf32>
      %151 = arith.addf %147, %150 : vector<1x4x1xf32>
      %152 = math.rsqrt %151 : vector<1x4x1xf32>
      %153 = arith.mulf %149, %152 : vector<1x4x1xf32>
      %c3_77 = arith.constant 3 : index
      %c0_78 = arith.constant 0 : index
      %c0_79 = arith.constant 0 : index
      %c0_80 = arith.constant 0 : index
      %154 = vector.load %arg3[%c3_77, %c0_78, %c0_79, %c0_80] : memref<8x1x4x1xf32, #tpu.memory_space<vmem>>, vector<1x1x4x1xf32>
      %155 = vector.shape_cast %154 : vector<1x1x4x1xf32> to vector<1x4x1xf32>
      %156 = arith.mulf %140, %153 : vector<1x4x1xf32>
      %157 = arith.subf %155, %156 : vector<1x4x1xf32>
      %158 = vector.broadcast %153 : vector<1x4x1xf32> to vector<2x4x128xf32>
      %159 = arith.mulf %136, %158 : vector<2x4x128xf32>
      %160 = vector.broadcast %157 : vector<1x4x1xf32> to vector<2x4x128xf32>
      %161 = arith.addf %159, %160 : vector<2x4x128xf32>
      %162 = vector.shape_cast %161 : vector<2x4x128xf32> to vector<8x128xf32>
      %c3_81 = arith.constant 3 : index
      %c0_82 = arith.constant 0 : index
      %c0_83 = arith.constant 0 : index
      %163 = vector.load %arg4[%c3_81, %c0_82, %c0_83] : memref<4x8x128xf32, #tpu.memory_space<vmem>>, vector<1x8x128xf32>
      %164 = vector.shape_cast %163 : vector<1x8x128xf32> to vector<8x128xf32>
      %165 = vector.shape_cast %162 : vector<8x128xf32> to vector<1x8x128xf32>
      tpu.vector_store %arg4[%c3_81, %c0_82, %c0_83], %165 {strides = array<i32>} : memref<4x8x128xf32, #tpu.memory_space<vmem>>, vector<1x8x128xf32>,
      %c3_84 = arith.constant 3 : index
      %c0_85 = arith.constant 0 : index
      %c0_86 = arith.constant 0 : index
      %166 = vector.load %arg5[%c3_84, %c0_85, %c0_86] : memref<4x8x128xf32, #tpu.memory_space<vmem>>, vector<1x8x128xf32>
      %167 = vector.shape_cast %166 : vector<1x8x128xf32> to vector<8x128xf32>
      %168 = vector.shape_cast %134 : vector<8x128xf32> to vector<1x8x128xf32>
      tpu.vector_store %arg5[%c3_84, %c0_85, %c0_86], %168 {strides = array<i32>} : memref<4x8x128xf32, #tpu.memory_space<vmem>>, vector<1x8x128xf32>,
    } else {
    }
    %c1_i32 = arith.constant 1 : i32
    %7 = arith.cmpi eq, %arg0, %c1_i32 : i32
    %8 = arith.extui %7 : i1 to i32
    %c0_i32_2 = arith.constant 0 : i32
    %9 = arith.cmpi ne, %8, %c0_i32_2 : i32
    scf.if %9 {
      %c8_i32 = arith.constant 8 : i32
      %10 = vector.broadcast %c8_i32 : i32 to vector<128x128xi32>
      %11 = arith.cmpi slt, %3, %10 : vector<128x128xi32>
      %cst = arith.constant 1.250000e-01 : f32
      %cst_3 = arith.constant 0.000000e+00 : f32
      %12 = vector.broadcast %cst : f32 to vector<128x128xf32>
      %13 = vector.broadcast %cst_3 : f32 to vector<128x128xf32>
      %14 = arith.select %11, %12, %13 : vector<128x128xi1>, vector<128x128xf32>
      %cst_4 = arith.constant dense<0.000000e+00> : vector<8x128xf32>
      %15 = tpu.matmul %0, %14, %cst_4 {dimension_numbers = #tpu.dot_dimension_numbers<[1], [0], [0], [1], [0, 0, 1, 1], [], []>} : vector<8x128xf32>, vector<128x128xf32>, vector<8x128xf32> -> vector<8x128xf32>
      %c16_i32 = arith.constant 16 : i32
      %16 = vector.broadcast %c16_i32 : i32 to vector<128x128xi32>
      %17 = arith.cmpi slt, %3, %16 : vector<128x128xi32>
      %cst_5 = arith.constant 6.250000e-02 : f32
      %cst_6 = arith.constant 0.000000e+00 : f32
      %18 = vector.broadcast %cst_5 : f32 to vector<128x128xf32>
      %19 = vector.broadcast %cst_6 : f32 to vector<128x128xf32>
      %20 = arith.select %17, %18, %19 : vector<128x128xi1>, vector<128x128xf32>
      %cst_7 = arith.constant dense<0.000000e+00> : vector<8x128xf32>
      %21 = tpu.matmul %0, %20, %cst_7 {dimension_numbers = #tpu.dot_dimension_numbers<[1], [0], [0], [1], [0, 0, 1, 1], [], []>} : vector<8x128xf32>, vector<128x128xf32>, vector<8x128xf32> -> vector<8x128xf32>
      %22 = arith.subf %15, %21 : vector<8x128xf32>
      %23 = vector.shape_cast %22 : vector<8x128xf32> to vector<2x4x128xf32>
      %cst_8 = arith.constant dense<0.000000e+00> : vector<4xf32>
      %24 = vector.multi_reduction <add>, %23, %cst_8 [0, 2] : vector<2x4x128xf32> to vector<4xf32>
      %25 = vector.shape_cast %24 : vector<4xf32> to vector<1x4x1xf32>
      %cst_9 = arith.constant 2.560000e+02 : f32
      %26 = vector.broadcast %cst_9 : f32 to vector<1x4x1xf32>
      %27 = arith.divf %25, %26 : vector<1x4x1xf32>
      %28 = vector.broadcast %27 : vector<1x4x1xf32> to vector<2x4x128xf32>
      %29 = arith.subf %23, %28 : vector<2x4x128xf32>
      %30 = arith.mulf %29, %29 : vector<2x4x128xf32>
      %cst_10 = arith.constant dense<0.000000e+00> : vector<4xf32>
      %31 = vector.multi_reduction <add>, %30, %cst_10 [0, 2] : vector<2x4x128xf32> to vector<4xf32>
      %32 = vector.shape_cast %31 : vector<4xf32> to vector<1x4x1xf32>
      %cst_11 = arith.constant 2.560000e+02 : f32
      %33 = vector.broadcast %cst_11 : f32 to vector<1x4x1xf32>
      %34 = arith.divf %32, %33 : vector<1x4x1xf32>
      %c4 = arith.constant 4 : index
      %c0_12 = arith.constant 0 : index
      %c0_13 = arith.constant 0 : index
      %c0_14 = arith.constant 0 : index
      %35 = vector.load %arg2[%c4, %c0_12, %c0_13, %c0_14] : memref<8x1x4x1xf32, #tpu.memory_space<vmem>>, vector<1x1x4x1xf32>
      %36 = vector.shape_cast %35 : vector<1x1x4x1xf32> to vector<1x4x1xf32>
      %cst_15 = arith.constant 9.99999974E-6 : f32
      %37 = vector.broadcast %cst_15 : f32 to vector<1x4x1xf32>
      %38 = arith.addf %34, %37 : vector<1x4x1xf32>
      %39 = math.rsqrt %38 : vector<1x4x1xf32>
      %40 = arith.mulf %36, %39 : vector<1x4x1xf32>
      %c4_16 = arith.constant 4 : index
      %c0_17 = arith.constant 0 : index
      %c0_18 = arith.constant 0 : index
      %c0_19 = arith.constant 0 : index
      %41 = vector.load %arg3[%c4_16, %c0_17, %c0_18, %c0_19] : memref<8x1x4x1xf32, #tpu.memory_space<vmem>>, vector<1x1x4x1xf32>
      %42 = vector.shape_cast %41 : vector<1x1x4x1xf32> to vector<1x4x1xf32>
      %43 = arith.mulf %27, %40 : vector<1x4x1xf32>
      %44 = arith.subf %42, %43 : vector<1x4x1xf32>
      %45 = vector.broadcast %40 : vector<1x4x1xf32> to vector<2x4x128xf32>
      %46 = arith.mulf %23, %45 : vector<2x4x128xf32>
      %47 = vector.broadcast %44 : vector<1x4x1xf32> to vector<2x4x128xf32>
      %48 = arith.addf %46, %47 : vector<2x4x128xf32>
      %49 = vector.shape_cast %48 : vector<2x4x128xf32> to vector<8x128xf32>
      %c0_20 = arith.constant 0 : index
      %c0_21 = arith.constant 0 : index
      %c0_22 = arith.constant 0 : index
      %50 = vector.load %arg4[%c0_20, %c0_21, %c0_22] : memref<4x8x128xf32, #tpu.memory_space<vmem>>, vector<1x8x128xf32>
      %51 = vector.shape_cast %50 : vector<1x8x128xf32> to vector<8x128xf32>
      %52 = vector.shape_cast %49 : vector<8x128xf32> to vector<1x8x128xf32>
      tpu.vector_store %arg4[%c0_20, %c0_21, %c0_22], %52 {strides = array<i32>} : memref<4x8x128xf32, #tpu.memory_space<vmem>>, vector<1x8x128xf32>,
      %c0_23 = arith.constant 0 : index
      %c0_24 = arith.constant 0 : index
      %c0_25 = arith.constant 0 : index
      %53 = vector.load %arg5[%c0_23, %c0_24, %c0_25] : memref<4x8x128xf32, #tpu.memory_space<vmem>>, vector<1x8x128xf32>
      %54 = vector.shape_cast %53 : vector<1x8x128xf32> to vector<8x128xf32>
      %55 = vector.shape_cast %15 : vector<8x128xf32> to vector<1x8x128xf32>
      tpu.vector_store %arg5[%c0_23, %c0_24, %c0_25], %55 {strides = array<i32>} : memref<4x8x128xf32, #tpu.memory_space<vmem>>, vector<1x8x128xf32>,
      %c4_i32 = arith.constant 4 : i32
      %56 = vector.broadcast %c4_i32 : i32 to vector<128x128xi32>
      %57 = arith.cmpi slt, %3, %56 : vector<128x128xi32>
      %cst_26 = arith.constant 2.500000e-01 : f32
      %cst_27 = arith.constant 0.000000e+00 : f32
      %58 = vector.broadcast %cst_26 : f32 to vector<128x128xf32>
      %59 = vector.broadcast %cst_27 : f32 to vector<128x128xf32>
      %60 = arith.select %57, %58, %59 : vector<128x128xi1>, vector<128x128xf32>
      %cst_28 = arith.constant dense<0.000000e+00> : vector<8x128xf32>
      %61 = tpu.matmul %0, %60, %cst_28 {dimension_numbers = #tpu.dot_dimension_numbers<[1], [0], [0], [1], [0, 0, 1, 1], [], []>} : vector<8x128xf32>, vector<128x128xf32>, vector<8x128xf32> -> vector<8x128xf32>
      %62 = arith.subf %61, %15 : vector<8x128xf32>
      %63 = vector.shape_cast %62 : vector<8x128xf32> to vector<2x4x128xf32>
      %cst_29 = arith.constant dense<0.000000e+00> : vector<4xf32>
      %64 = vector.multi_reduction <add>, %63, %cst_29 [0, 2] : vector<2x4x128xf32> to vector<4xf32>
      %65 = vector.shape_cast %64 : vector<4xf32> to vector<1x4x1xf32>
      %cst_30 = arith.constant 2.560000e+02 : f32
      %66 = vector.broadcast %cst_30 : f32 to vector<1x4x1xf32>
      %67 = arith.divf %65, %66 : vector<1x4x1xf32>
      %68 = vector.broadcast %67 : vector<1x4x1xf32> to vector<2x4x128xf32>
      %69 = arith.subf %63, %68 : vector<2x4x128xf32>
      %70 = arith.mulf %69, %69 : vector<2x4x128xf32>
      %cst_31 = arith.constant dense<0.000000e+00> : vector<4xf32>
      %71 = vector.multi_reduction <add>, %70, %cst_31 [0, 2] : vector<2x4x128xf32> to vector<4xf32>
      %72 = vector.shape_cast %71 : vector<4xf32> to vector<1x4x1xf32>
      %cst_32 = arith.constant 2.560000e+02 : f32
      %73 = vector.broadcast %cst_32 : f32 to vector<1x4x1xf32>
      %74 = arith.divf %72, %73 : vector<1x4x1xf32>
      %c5 = arith.constant 5 : index
      %c0_33 = arith.constant 0 : index
      %c0_34 = arith.constant 0 : index
      %c0_35 = arith.constant 0 : index
      %75 = vector.load %arg2[%c5, %c0_33, %c0_34, %c0_35] : memref<8x1x4x1xf32, #tpu.memory_space<vmem>>, vector<1x1x4x1xf32>
      %76 = vector.shape_cast %75 : vector<1x1x4x1xf32> to vector<1x4x1xf32>
      %cst_36 = arith.constant 9.99999974E-6 : f32
      %77 = vector.broadcast %cst_36 : f32 to vector<1x4x1xf32>
      %78 = arith.addf %74, %77 : vector<1x4x1xf32>
      %79 = math.rsqrt %78 : vector<1x4x1xf32>
      %80 = arith.mulf %76, %79 : vector<1x4x1xf32>
      %c5_37 = arith.constant 5 : index
      %c0_38 = arith.constant 0 : index
      %c0_39 = arith.constant 0 : index
      %c0_40 = arith.constant 0 : index
      %81 = vector.load %arg3[%c5_37, %c0_38, %c0_39, %c0_40] : memref<8x1x4x1xf32, #tpu.memory_space<vmem>>, vector<1x1x4x1xf32>
      %82 = vector.shape_cast %81 : vector<1x1x4x1xf32> to vector<1x4x1xf32>
      %83 = arith.mulf %67, %80 : vector<1x4x1xf32>
      %84 = arith.subf %82, %83 : vector<1x4x1xf32>
      %85 = vector.broadcast %80 : vector<1x4x1xf32> to vector<2x4x128xf32>
      %86 = arith.mulf %63, %85 : vector<2x4x128xf32>
      %87 = vector.broadcast %84 : vector<1x4x1xf32> to vector<2x4x128xf32>
      %88 = arith.addf %86, %87 : vector<2x4x128xf32>
      %89 = vector.shape_cast %88 : vector<2x4x128xf32> to vector<8x128xf32>
      %c1 = arith.constant 1 : index
      %c0_41 = arith.constant 0 : index
      %c0_42 = arith.constant 0 : index
      %90 = vector.load %arg4[%c1, %c0_41, %c0_42] : memref<4x8x128xf32, #tpu.memory_space<vmem>>, vector<1x8x128xf32>
      %91 = vector.shape_cast %90 : vector<1x8x128xf32> to vector<8x128xf32>
      %92 = vector.shape_cast %89 : vector<8x128xf32> to vector<1x8x128xf32>
      tpu.vector_store %arg4[%c1, %c0_41, %c0_42], %92 {strides = array<i32>} : memref<4x8x128xf32, #tpu.memory_space<vmem>>, vector<1x8x128xf32>,
      %c1_43 = arith.constant 1 : index
      %c0_44 = arith.constant 0 : index
      %c0_45 = arith.constant 0 : index
      %93 = vector.load %arg5[%c1_43, %c0_44, %c0_45] : memref<4x8x128xf32, #tpu.memory_space<vmem>>, vector<1x8x128xf32>
      %94 = vector.shape_cast %93 : vector<1x8x128xf32> to vector<8x128xf32>
      %95 = vector.shape_cast %61 : vector<8x128xf32> to vector<1x8x128xf32>
      tpu.vector_store %arg5[%c1_43, %c0_44, %c0_45], %95 {strides = array<i32>} : memref<4x8x128xf32, #tpu.memory_space<vmem>>, vector<1x8x128xf32>,
      %c2_i32 = arith.constant 2 : i32
      %96 = vector.broadcast %c2_i32 : i32 to vector<128x128xi32>
      %97 = arith.cmpi slt, %3, %96 : vector<128x128xi32>
      %cst_46 = arith.constant 5.000000e-01 : f32
      %cst_47 = arith.constant 0.000000e+00 : f32
      %98 = vector.broadcast %cst_46 : f32 to vector<128x128xf32>
      %99 = vector.broadcast %cst_47 : f32 to vector<128x128xf32>
      %100 = arith.select %97, %98, %99 : vector<128x128xi1>, vector<128x128xf32>
      %cst_48 = arith.constant dense<0.000000e+00> : vector<8x128xf32>
      %101 = tpu.matmul %0, %100, %cst_48 {dimension_numbers = #tpu.dot_dimension_numbers<[1], [0], [0], [1], [0, 0, 1, 1], [], []>} : vector<8x128xf32>, vector<128x128xf32>, vector<8x128xf32> -> vector<8x128xf32>
      %102 = arith.subf %101, %61 : vector<8x128xf32>
      %103 = vector.shape_cast %102 : vector<8x128xf32> to vector<2x4x128xf32>
      %cst_49 = arith.constant dense<0.000000e+00> : vector<4xf32>
      %104 = vector.multi_reduction <add>, %103, %cst_49 [0, 2] : vector<2x4x128xf32> to vector<4xf32>
      %105 = vector.shape_cast %104 : vector<4xf32> to vector<1x4x1xf32>
      %cst_50 = arith.constant 2.560000e+02 : f32
      %106 = vector.broadcast %cst_50 : f32 to vector<1x4x1xf32>
      %107 = arith.divf %105, %106 : vector<1x4x1xf32>
      %108 = vector.broadcast %107 : vector<1x4x1xf32> to vector<2x4x128xf32>
      %109 = arith.subf %103, %108 : vector<2x4x128xf32>
      %110 = arith.mulf %109, %109 : vector<2x4x128xf32>
      %cst_51 = arith.constant dense<0.000000e+00> : vector<4xf32>
      %111 = vector.multi_reduction <add>, %110, %cst_51 [0, 2] : vector<2x4x128xf32> to vector<4xf32>
      %112 = vector.shape_cast %111 : vector<4xf32> to vector<1x4x1xf32>
      %cst_52 = arith.constant 2.560000e+02 : f32
      %113 = vector.broadcast %cst_52 : f32 to vector<1x4x1xf32>
      %114 = arith.divf %112, %113 : vector<1x4x1xf32>
      %c6 = arith.constant 6 : index
      %c0_53 = arith.constant 0 : index
      %c0_54 = arith.constant 0 : index
      %c0_55 = arith.constant 0 : index
      %115 = vector.load %arg2[%c6, %c0_53, %c0_54, %c0_55] : memref<8x1x4x1xf32, #tpu.memory_space<vmem>>, vector<1x1x4x1xf32>
      %116 = vector.shape_cast %115 : vector<1x1x4x1xf32> to vector<1x4x1xf32>
      %cst_56 = arith.constant 9.99999974E-6 : f32
      %117 = vector.broadcast %cst_56 : f32 to vector<1x4x1xf32>
      %118 = arith.addf %114, %117 : vector<1x4x1xf32>
      %119 = math.rsqrt %118 : vector<1x4x1xf32>
      %120 = arith.mulf %116, %119 : vector<1x4x1xf32>
      %c6_57 = arith.constant 6 : index
      %c0_58 = arith.constant 0 : index
      %c0_59 = arith.constant 0 : index
      %c0_60 = arith.constant 0 : index
      %121 = vector.load %arg3[%c6_57, %c0_58, %c0_59, %c0_60] : memref<8x1x4x1xf32, #tpu.memory_space<vmem>>, vector<1x1x4x1xf32>
      %122 = vector.shape_cast %121 : vector<1x1x4x1xf32> to vector<1x4x1xf32>
      %123 = arith.mulf %107, %120 : vector<1x4x1xf32>
      %124 = arith.subf %122, %123 : vector<1x4x1xf32>
      %125 = vector.broadcast %120 : vector<1x4x1xf32> to vector<2x4x128xf32>
      %126 = arith.mulf %103, %125 : vector<2x4x128xf32>
      %127 = vector.broadcast %124 : vector<1x4x1xf32> to vector<2x4x128xf32>
      %128 = arith.addf %126, %127 : vector<2x4x128xf32>
      %129 = vector.shape_cast %128 : vector<2x4x128xf32> to vector<8x128xf32>
      %c2 = arith.constant 2 : index
      %c0_61 = arith.constant 0 : index
      %c0_62 = arith.constant 0 : index
      %130 = vector.load %arg4[%c2, %c0_61, %c0_62] : memref<4x8x128xf32, #tpu.memory_space<vmem>>, vector<1x8x128xf32>
      %131 = vector.shape_cast %130 : vector<1x8x128xf32> to vector<8x128xf32>
      %132 = vector.shape_cast %129 : vector<8x128xf32> to vector<1x8x128xf32>
      tpu.vector_store %arg4[%c2, %c0_61, %c0_62], %132 {strides = array<i32>} : memref<4x8x128xf32, #tpu.memory_space<vmem>>, vector<1x8x128xf32>,
      %c2_63 = arith.constant 2 : index
      %c0_64 = arith.constant 0 : index
      %c0_65 = arith.constant 0 : index
      %133 = vector.load %arg5[%c2_63, %c0_64, %c0_65] : memref<4x8x128xf32, #tpu.memory_space<vmem>>, vector<1x8x128xf32>
      %134 = vector.shape_cast %133 : vector<1x8x128xf32> to vector<8x128xf32>
      %135 = vector.shape_cast %101 : vector<8x128xf32> to vector<1x8x128xf32>
      tpu.vector_store %arg5[%c2_63, %c0_64, %c0_65], %135 {strides = array<i32>} : memref<4x8x128xf32, #tpu.memory_space<vmem>>, vector<1x8x128xf32>,
      %c1_i32_66 = arith.constant 1 : i32
      %136 = vector.broadcast %c1_i32_66 : i32 to vector<128x128xi32>
      %137 = arith.cmpi slt, %3, %136 : vector<128x128xi32>
      %cst_67 = arith.constant 1.000000e+00 : f32
      %cst_68 = arith.constant 0.000000e+00 : f32
      %138 = vector.broadcast %cst_67 : f32 to vector<128x128xf32>
      %139 = vector.broadcast %cst_68 : f32 to vector<128x128xf32>
      %140 = arith.select %137, %138, %139 : vector<128x128xi1>, vector<128x128xf32>
      %cst_69 = arith.constant dense<0.000000e+00> : vector<8x128xf32>
      %141 = tpu.matmul %0, %140, %cst_69 {dimension_numbers = #tpu.dot_dimension_numbers<[1], [0], [0], [1], [0, 0, 1, 1], [], []>} : vector<8x128xf32>, vector<128x128xf32>, vector<8x128xf32> -> vector<8x128xf32>
      %142 = arith.subf %141, %101 : vector<8x128xf32>
      %143 = vector.shape_cast %142 : vector<8x128xf32> to vector<2x4x128xf32>
      %cst_70 = arith.constant dense<0.000000e+00> : vector<4xf32>
      %144 = vector.multi_reduction <add>, %143, %cst_70 [0, 2] : vector<2x4x128xf32> to vector<4xf32>
      %145 = vector.shape_cast %144 : vector<4xf32> to vector<1x4x1xf32>
      %cst_71 = arith.constant 2.560000e+02 : f32
      %146 = vector.broadcast %cst_71 : f32 to vector<1x4x1xf32>
      %147 = arith.divf %145, %146 : vector<1x4x1xf32>
      %148 = vector.broadcast %147 : vector<1x4x1xf32> to vector<2x4x128xf32>
      %149 = arith.subf %143, %148 : vector<2x4x128xf32>
      %150 = arith.mulf %149, %149 : vector<2x4x128xf32>
      %cst_72 = arith.constant dense<0.000000e+00> : vector<4xf32>
      %151 = vector.multi_reduction <add>, %150, %cst_72 [0, 2] : vector<2x4x128xf32> to vector<4xf32>
      %152 = vector.shape_cast %151 : vector<4xf32> to vector<1x4x1xf32>
      %cst_73 = arith.constant 2.560000e+02 : f32
      %153 = vector.broadcast %cst_73 : f32 to vector<1x4x1xf32>
      %154 = arith.divf %152, %153 : vector<1x4x1xf32>
      %c7 = arith.constant 7 : index
      %c0_74 = arith.constant 0 : index
      %c0_75 = arith.constant 0 : index
      %c0_76 = arith.constant 0 : index
      %155 = vector.load %arg2[%c7, %c0_74, %c0_75, %c0_76] : memref<8x1x4x1xf32, #tpu.memory_space<vmem>>, vector<1x1x4x1xf32>
      %156 = vector.shape_cast %155 : vector<1x1x4x1xf32> to vector<1x4x1xf32>
      %cst_77 = arith.constant 9.99999974E-6 : f32
      %157 = vector.broadcast %cst_77 : f32 to vector<1x4x1xf32>
      %158 = arith.addf %154, %157 : vector<1x4x1xf32>
      %159 = math.rsqrt %158 : vector<1x4x1xf32>
      %160 = arith.mulf %156, %159 : vector<1x4x1xf32>
      %c7_78 = arith.constant 7 : index
      %c0_79 = arith.constant 0 : index
      %c0_80 = arith.constant 0 : index
      %c0_81 = arith.constant 0 : index
      %161 = vector.load %arg3[%c7_78, %c0_79, %c0_80, %c0_81] : memref<8x1x4x1xf32, #tpu.memory_space<vmem>>, vector<1x1x4x1xf32>
      %162 = vector.shape_cast %161 : vector<1x1x4x1xf32> to vector<1x4x1xf32>
      %163 = arith.mulf %147, %160 : vector<1x4x1xf32>
      %164 = arith.subf %162, %163 : vector<1x4x1xf32>
      %165 = vector.broadcast %160 : vector<1x4x1xf32> to vector<2x4x128xf32>
      %166 = arith.mulf %143, %165 : vector<2x4x128xf32>
      %167 = vector.broadcast %164 : vector<1x4x1xf32> to vector<2x4x128xf32>
      %168 = arith.addf %166, %167 : vector<2x4x128xf32>
      %169 = vector.shape_cast %168 : vector<2x4x128xf32> to vector<8x128xf32>
      %c3 = arith.constant 3 : index
      %c0_82 = arith.constant 0 : index
      %c0_83 = arith.constant 0 : index
      %170 = vector.load %arg4[%c3, %c0_82, %c0_83] : memref<4x8x128xf32, #tpu.memory_space<vmem>>, vector<1x8x128xf32>
      %171 = vector.shape_cast %170 : vector<1x8x128xf32> to vector<8x128xf32>
      %172 = vector.shape_cast %169 : vector<8x128xf32> to vector<1x8x128xf32>
      tpu.vector_store %arg4[%c3, %c0_82, %c0_83], %172 {strides = array<i32>} : memref<4x8x128xf32, #tpu.memory_space<vmem>>, vector<1x8x128xf32>,
      %c3_84 = arith.constant 3 : index
      %c0_85 = arith.constant 0 : index
      %c0_86 = arith.constant 0 : index
      %173 = vector.load %arg5[%c3_84, %c0_85, %c0_86] : memref<4x8x128xf32, #tpu.memory_space<vmem>>, vector<1x8x128xf32>
      %174 = vector.shape_cast %173 : vector<1x8x128xf32> to vector<8x128xf32>
      %175 = vector.shape_cast %141 : vector<8x128xf32> to vector<1x8x128xf32>
      tpu.vector_store %arg5[%c3_84, %c0_85, %c0_86], %175 {strides = array<i32>} : memref<4x8x128xf32, #tpu.memory_space<vmem>>, vector<1x8x128xf32>,
    } else {
    }
    return
  }
  func.func @transform_0(%arg0: i32) -> (i32, i32) {
    %c0_i32 = arith.constant 0 : i32
    %c0_i32_0 = arith.constant 0 : i32
    %c0_i32_1 = arith.constant 0 : i32
    return %c0_i32, %c0_i32_0 : i32, i32
  }
  func.func @transform_1(%arg0: i32) -> (i32, i32, i32, i32) {
    %c0_i32 = arith.constant 0 : i32
    %c0_i32_0 = arith.constant 0 : i32
    %c0_i32_1 = arith.constant 0 : i32
    %c0_i32_2 = arith.constant 0 : i32
    %c0_i32_3 = arith.constant 0 : i32
    return %c0_i32, %c0_i32_0, %c0_i32_1, %c0_i32_2 : i32, i32, i32, i32
  }
  func.func @transform_2(%arg0: i32) -> (i32, i32, i32, i32) {
    %c0_i32 = arith.constant 0 : i32
    %c0_i32_0 = arith.constant 0 : i32
    %c0_i32_1 = arith.constant 0 : i32
    %c0_i32_2 = arith.constant 0 : i32
    %c0_i32_3 = arith.constant 0 : i32
    return %c0_i32, %c0_i32_0, %c0_i32_1, %c0_i32_2 : i32, i32, i32, i32
  }
  func.func @transform_3(%arg0: i32) -> (i32, i32, i32) {
    %c0_i32 = arith.constant 0 : i32
    %c0_i32_0 = arith.constant 0 : i32
    %c0_i32_1 = arith.constant 0 : i32
    return %arg0, %c0_i32, %c0_i32_0 : i32, i32, i32
  }
  func.func @transform_4(%arg0: i32) -> (i32, i32, i32) {
    %c0_i32 = arith.constant 0 : i32
    %c0_i32_0 = arith.constant 0 : i32
    %c0_i32_1 = arith.constant 0 : i32
    return %arg0, %c0_i32, %c0_i32_0 : i32, i32, i32
  }
}

</mosaic_0001>

<bundles_post_ra>
// kernel: wavelet_base_forward.1
= control target key start
LH: loop header
LB: loop body
LE: loop exit
PB: predicated region body
PF: predicated region fallthrough
CT: control target
= control target key end

     0   :  { %10 = vsyncpa [#allocation3], 0  ;;  %s2385_s0 = inlined_call_operand.vmem [shape: f32[8,128], index: 0, kind: input, shape index: {}]   ;;  %s2386_s1 = inlined_call_operand.vmem [shape: f32[8,1,4,1], index: 1, kind: input, shape index: {}]   ;;  %s2387_s2 = inlined_call_operand.vmem [shape: f32[8,1,4,1], index: 2, kind: input, shape index: {}]   ;;  %s2388_s3 = inlined_call_operand.hbm [shape: f32[8,8,128], index: 3, kind: output, shape index: {0}]   ;;  %s2389_s4 = inlined_call_operand.hbm [shape: f32[8,8,128], index: 4, kind: output, shape index: {1}]  }
   0x1   :  { %12 = vsyncpa [#allocation3 + $0x1], 0 }
   0x2   :  { %13 = vsyncpa [#allocation5], 0 }
   0x3   :  { %15 = vsyncpa [#allocation5 + $0x1], 0  ;;  %s1727_s15 = smov 0   ;;  %s1729_s16 = smov 0  }
   0x4   :  { %s1731_s17 = smov 0   ;;  %s1733_s18 = smov 0  }
   0x5 LB: > { %s1748_s19 = sadd.s32 4294967295, %s1685_s18   ;;  %s1335_s20 = sadd.s32 4294967294, %s1685_s18   ;;  %s1685_s18 = sphi %s1733_s18, %s2395_s18   ;;  %s1681_s17 = sphi %s1731_s17, %s2394_s17   ;;  %s1677_s16 = sphi %s1729_s16, %s2393_s16   ;;  %s1673_s15 = sphi %s1727_s15, %s2392_s15  }
   0x6   : > { %s1752_s21 = sadd.s32 1, %s1685_s18   ;;  %s91_s22 = sadd.s32 1, %s1681_s17 }
   0x7   : > { %s88_s23 = ssub.s32 %s1685_s18, %s1752_s21  ;;  %p101_p0 = scmp.ne.s32.totalorder %s1681_s17, %s1677_s16 }
   0x8   : > { %p89_p1 = scmp.eq.s32.totalorder %s88_s23, 0  ;;  %p102_p2 = scmp.eq.s32.totalorder %s1748_s19, 1 }
   0x9   : > { %p107_p3 = scmp.ne.s32.totalorder %s1677_s16, %s1673_s15  ;;  %p108_p4 = scmp.eq.s32.totalorder %s1335_s20, 1 }
   0xa   : > { %s1763_s24 = scalar_select %p89_p1, %s1681_s17, %s91_s22  }
   0xb   : > { %p1765_p5 = por %p102_p2, %p101_p0  ;;  %p1769_p6 = por %p108_p4, %p107_p3 }
   0xc   : > { %p1337_p7 = scmp.ge.s32.totalorder %s1685_s18, 1  ;;  %p161_p8 = scmp.lt.s32.totalorder %s1685_s18, 3 }
   0xe   : > { %p162_p9 = pnand %p1337_p7, %p161_p8 }
   0xf   : > { %s1776_s27 = sand.u32 (!%p162_p9), 1, %s1677_s16   ;;  %p1340_p10 = scmp.ne.s32.totalorder (!%p162_p9), %s1748_s19, 0 }
  0x10   : > { %165 = sbr.rel (%p162_p9) target bundleno = 1255 (0x4e7), region = 32  ;;  %s1338_s30 = sshll.u32 (!%p162_p9), %s1776_s27, 5 }
  0x11   : > { %s1818_s5 = scalar_lea.vmem (!%p162_p9), [#allocation2], %s1338_s30  ;;  %s1822_s6 = scalar_lea.vmem (!%p162_p9), [#allocation4], %s1338_s30 }
  0x15   : > { %v1781_v0 = vld [vmem:[%s2385_s0] sm:$0xff]  ;;  %v190_v1 = vlaneseq }
  0x17   : > { %v191_v2 = vshrl.u32 %v190_v1, 7  ;;  %v208_v3 = vand.u32 127, %v190_v1 }
  0x19   : > { %v192_v4 = vadd.s32 8, %v191_v2  ;;  %v193_v5 = vadd.s32 16, %v191_v2  ;;  %v194_v6 = vadd.s32 24, %v191_v2  ;;  %v195_v7 = vadd.s32 32, %v191_v2 }
  0x1a   : > { %v196_v8 = vadd.s32 40, %v191_v2  ;;  %v197_v9 = vadd.s32 48, %v191_v2  ;;  %v198_v10 = vadd.s32 56, %v191_v2  ;;  %v199_v11 = vadd.s32 64, %v191_v2 }
  0x1b   : > { %v200_v12 = vadd.s32 72, %v191_v2  ;;  %v201_v13 = vadd.s32 80, %v191_v2  ;;  %v202_v14 = vadd.s32 88, %v191_v2  ;;  %v203_v15 = vadd.s32 96, %v191_v2 }
  0x1c   : > { %v204_v16 = vadd.s32 104, %v191_v2  ;;  %v205_v17 = vadd.s32 112, %v191_v2  ;;  %v206_v18 = vadd.s32 120, %v191_v2  ;;  %v1784_v19 = vxor.u32 %v208_v3, %v191_v2  ;;  %228 = sbr.rel (%p1340_p10) target bundleno = 623 (0x26f), region = 36 }
  0x1d   : > { %v1786_v20 = vxor.u32 %v208_v3, %v192_v4  ;;  %v1788_v21 = vxor.u32 %v208_v3, %v193_v5  ;;  %v1790_v22 = vxor.u32 %v208_v3, %v194_v6  ;;  %v1792_v23 = vxor.u32 %v208_v3, %v195_v7 }
  0x1e   : > { %v1794_v24 = vxor.u32 %v208_v3, %v196_v8  ;;  %v1796_v25 = vxor.u32 %v208_v3, %v197_v9  ;;  %v1798_v26 = vxor.u32 %v208_v3, %v198_v10  ;;  %v1800_v27 = vxor.u32 %v208_v3, %v199_v11 }
  0x1f   : > { %v1802_v28 = vxor.u32 %v208_v3, %v200_v12  ;;  %v1804_v29 = vxor.u32 %v208_v3, %v201_v13  ;;  %v1806_v30 = vxor.u32 %v208_v3, %v202_v14  ;;  %v1808_v31 = vxor.u32 %v208_v3, %v203_v15 }
  0x20   : > { %v1810_v32 = vxor.u32 %v208_v3, %v204_v16  ;;  %v1812_v33 = vxor.u32 %v208_v3, %v205_v17  ;;  %v1814_v34 = vxor.u32 %v208_v3, %v206_v18 }
  0x21   : > { %v1687_v35 = vmov 0.0078125   ;;  %v1688_v36 = vmov 0.015625   ;;  %v1689_v37 = vmov 0.03125   ;;  %vm359_vm8 = vcmp.lt.s32.totalorder %v1808_v31, 64 }
  0x22   : > { %vm362_vm0 = vcmp.lt.s32.totalorder %v1814_v34, 64  ;;  %vm477_vm1 = vcmp.lt.s32.totalorder %v1814_v34, 32  ;;  %261 = vmatpush.msra.mxu0 %v1687_v35  ;;  %vm361_vm2 = vcmp.lt.s32.totalorder %v1812_v33, 64  ;;  %vm476_vm3 = vcmp.lt.s32.totalorder %v1812_v33, 32 }
  0x23   : > { %1341 = vmatpush.msk.msra.mxu1 %vm362_vm0, %v1688_v36  ;;  %1361 = vmatpush.msk.msra.mxu2 %vm477_vm1, %v1689_v37  ;;  %vm360_vm4 = vcmp.lt.s32.totalorder %v1810_v32, 64  ;;  %vm592_vm5 = vcmp.lt.s32.totalorder %v1814_v34, 16  ;;  %vm475_vm6 = vcmp.lt.s32.totalorder %v1810_v32, 32  ;;  %vm591_vm7 = vcmp.lt.s32.totalorder %v1812_v33, 16 }
  0x24   : > { %262 = vmatpush.msra.mxu0 %v1687_v35  ;;  %v1690_v38 = vmov 0.0625   ;;  %vm474_vm9 = vcmp.lt.s32.totalorder %v1808_v31, 32  ;;  %vm590_vm10 = vcmp.lt.s32.totalorder %v1810_v32, 16  ;;  %vm358_vm11 = vcmp.lt.s32.totalorder %v1806_v30, 64 }
  0x25   : > { %1342 = vmatpush.msk.msra.mxu1 %vm361_vm2, %v1688_v36  ;;  %1362 = vmatpush.msk.msra.mxu2 %vm476_vm3, %v1689_v37  ;;  %vm473_vm12 = vcmp.lt.s32.totalorder %v1806_v30, 32  ;;  %vm589_vm13 = vcmp.lt.s32.totalorder %v1808_v31, 16  ;;  %vm357_vm14 = vcmp.lt.s32.totalorder %v1804_v29, 64  ;;  %vm472_vm15 = vcmp.lt.s32.totalorder %v1804_v29, 32 }
  0x26   : > { %1381 = vmatpush.msk.msra.mxu3 %vm592_vm5, %v1690_v38  ;;  %263 = vmatpush.msra.mxu0 %v1687_v35  ;;  %vm588_vm0 = vcmp.lt.s32.totalorder %v1806_v30, 16  ;;  %vm356_vm1 = vcmp.lt.s32.totalorder %v1802_v28, 64  ;;  %vm471_vm2 = vcmp.lt.s32.totalorder %v1802_v28, 32  ;;  %vm587_vm3 = vcmp.lt.s32.totalorder %v1804_v29, 16 }
  0x27   : > { %1343 = vmatpush.msk.msra.mxu1 %vm360_vm4, %v1688_v36  ;;  %1363 = vmatpush.msk.msra.mxu2 %vm475_vm6, %v1689_v37  ;;  %vm355_vm4 = vcmp.lt.s32.totalorder %v1800_v27, 64  ;;  %vm470_vm5 = vcmp.lt.s32.totalorder %v1800_v27, 32  ;;  %vm586_vm6 = vcmp.lt.s32.totalorder %v1802_v28, 16  ;;  %v1691_v62 = vmov 256.0  }
  0x28   : > { %1382 = vmatpush.msk.msra.mxu3 %vm591_vm7, %v1690_v38  ;;  %264 = vmatpush.msra.mxu0 %v1687_v35  ;;  %vm354_vm7 = vcmp.lt.s32.totalorder %v1798_v26, 64  ;;  %1568 = vrcp.f32 %v1691_v62 }
  0x29   : > { %1344 = vmatpush.msk.msra.mxu1 %vm359_vm8, %v1688_v36  ;;  %1364 = vmatpush.msk.msra.mxu2 %vm474_vm9, %v1689_v37  ;;  %vm469_vm8 = vcmp.lt.s32.totalorder %v1798_v26, 32  ;;  %vm585_vm9 = vcmp.lt.s32.totalorder %v1800_v27, 16 }
  0x2a   : > { %1383 = vmatpush.msk.msra.mxu3 %vm590_vm10, %v1690_v38  ;;  %265 = vmatpush.msra.mxu0 %v1687_v35  ;;  %vm353_vm10 = vcmp.lt.s32.totalorder %v1796_v25, 64 }
  0x2b   : > { %1345 = vmatpush.msk.msra.mxu1 %vm358_vm11, %v1688_v36  ;;  %1365 = vmatpush.msk.msra.mxu2 %vm473_vm12, %v1689_v37  ;;  %vm468_vm11 = vcmp.lt.s32.totalorder %v1796_v25, 32  ;;  %vm584_vm12 = vcmp.lt.s32.totalorder %v1798_v26, 16 }
  0x2c   : > { %1384 = vmatpush.msk.msra.mxu3 %vm589_vm13, %v1690_v38  ;;  %266 = vmatpush.msra.mxu0 %v1687_v35  ;;  %vm352_vm13 = vcmp.lt.s32.totalorder %v1794_v24, 64 }
  0x2d   : > { %1346 = vmatpush.msk.msra.mxu1 %vm357_vm14, %v1688_v36  ;;  %1366 = vmatpush.msk.msra.mxu2 %vm472_vm15, %v1689_v37  ;;  %vm467_vm14 = vcmp.lt.s32.totalorder %v1794_v24, 32  ;;  %vm583_vm15 = vcmp.lt.s32.totalorder %v1796_v25, 16 }
  0x2e   : > { %1385 = vmatpush.msk.msra.mxu3 %vm588_vm0, %v1690_v38  ;;  %267 = vmatpush.msra.mxu0 %v1687_v35  ;;  %vm351_vm0 = vcmp.lt.s32.totalorder %v1792_v23, 64  ;;  %v1569_v63 = vpop.eup %1568 }
  0x2f   : > { %1347 = vmatpush.msk.msra.mxu1 %vm356_vm1, %v1688_v36  ;;  %1367 = vmatpush.msk.msra.mxu2 %vm471_vm2, %v1689_v37  ;;  %vm466_vm1 = vcmp.lt.s32.totalorder %v1792_v23, 32  ;;  %vm582_vm2 = vcmp.lt.s32.totalorder %v1794_v24, 16  ;;  %v291_v1 = vmul.f32 256.0, %v1569_v63 }
  0x30   : > { %1386 = vmatpush.msk.msra.mxu3 %vm587_vm3, %v1690_v38  ;;  %268 = vmatpush.msra.mxu0 %v1687_v35  ;;  %vm350_vm3 = vcmp.lt.s32.totalorder %v1790_v22, 64 }
  0x31   : > { %1348 = vmatpush.msk.msra.mxu1 %vm355_vm4, %v1688_v36  ;;  %1368 = vmatpush.msk.msra.mxu2 %vm470_vm5, %v1689_v37  ;;  %vm465_vm4 = vcmp.lt.s32.totalorder %v1790_v22, 32  ;;  %vm581_vm5 = vcmp.lt.s32.totalorder %v1792_v23, 16  ;;  %v292_v2 = vsub.f32 1.0, %v291_v1 }
  0x32   : > { %1387 = vmatpush.msk.msra.mxu3 %vm586_vm6, %v1690_v38  ;;  %269 = vmatpush.msra.mxu0 %v1687_v35  ;;  %vm349_vm6 = vcmp.lt.s32.totalorder %v1788_v21, 64 }
  0x33   : > { %1349 = vmatpush.msk.msra.mxu1 %vm354_vm7, %v1688_v36  ;;  %1369 = vmatpush.msk.msra.mxu2 %vm469_vm8, %v1689_v37  ;;  %vm464_vm7 = vcmp.lt.s32.totalorder %v1788_v21, 32  ;;  %vm580_vm8 = vcmp.lt.s32.totalorder %v1790_v22, 16  ;;  %v293_v3 = vmul.f32 %v1569_v63, %v292_v2 }
  0x34   : > { %1388 = vmatpush.msk.msra.mxu3 %vm585_vm9, %v1690_v38  ;;  %270 = vmatpush.msra.mxu0 %v1687_v35  ;;  %vm348_vm9 = vcmp.lt.s32.totalorder %v1786_v20, 64 }
  0x35   : > { %1350 = vmatpush.msk.msra.mxu1 %vm353_vm10, %v1688_v36  ;;  %1370 = vmatpush.msk.msra.mxu2 %vm468_vm11, %v1689_v37  ;;  %vm463_vm10 = vcmp.lt.s32.totalorder %v1786_v20, 32  ;;  %vm579_vm11 = vcmp.lt.s32.totalorder %v1788_v21, 16  ;;  %v294_v4 = vadd.f32 %v1569_v63, %v293_v3  ;;  %v1692_v3 = vmov 0  }
  0x36   : > { %1389 = vmatpush.msk.msra.mxu3 %vm584_vm12, %v1690_v38  ;;  %271 = vmatpush.msra.mxu0 %v1687_v35  ;;  %vm347_vm12 = vcmp.lt.s32.totalorder %v1784_v19, 64 }
  0x37   : > { %1351 = vmatpush.msk.msra.mxu1 %vm352_vm13, %v1688_v36  ;;  %1371 = vmatpush.msk.msra.mxu2 %vm467_vm14, %v1689_v37  ;;  %vm462_vm13 = vcmp.lt.s32.totalorder %v1784_v19, 32  ;;  %vm578_vm14 = vcmp.lt.s32.totalorder %v1786_v20, 16 }
  0x38   : > { %1390 = vmatpush.msk.msra.mxu3 %vm583_vm15, %v1690_v38  ;;  %272 = vmatpush.msra.mxu0 %v1687_v35  ;;  %vm577_vm15 = vcmp.lt.s32.totalorder %v1784_v19, 16 }
  0x39   : > { %1352 = vmatpush.msk.msra.mxu1 %vm351_vm0, %v1688_v36  ;;  %1372 = vmatpush.msk.msra.mxu2 %vm466_vm1, %v1689_v37  ;;  %vm284_vm0 = vcmask 1043456   ;;  %vm295_vm1 = vweird.f32 %v1569_v63 }
  0x3a   : > { %1391 = vmatpush.msk.msra.mxu3 %vm582_vm2, %v1690_v38  ;;  %273 = vmatpush.msra.mxu0 %v1687_v35  ;;  %v1983_v5 = vsel %vm295_vm1, %v1569_v63, %v294_v4 }
  0x3b   : > { %1353 = vmatpush.msk.msra.mxu1 %vm350_vm3, %v1688_v36  ;;  %1373 = vmatpush.msk.msra.mxu2 %vm465_vm4, %v1689_v37 }
  0x3c   : > { %1392 = vmatpush.msk.msra.mxu3 %vm581_vm5, %v1690_v38  ;;  %274 = vmatpush.msra.mxu0 %v1687_v35 }
  0x3d   : > { %1354 = vmatpush.msk.msra.mxu1 %vm349_vm6, %v1688_v36  ;;  %1374 = vmatpush.msk.msra.mxu2 %vm464_vm7, %v1689_v37 }
  0x3e   : > { %1393 = vmatpush.msk.msra.mxu3 %vm580_vm8, %v1690_v38  ;;  %275 = vmatpush.msra.mxu0 %v1687_v35 }
  0x3f   : > { %1355 = vmatpush.msk.msra.mxu1 %vm348_vm9, %v1688_v36  ;;  %1375 = vmatpush.msk.msra.mxu2 %vm463_vm10, %v1689_v37 }
  0x40   : > { %1394 = vmatpush.msk.msra.mxu3 %vm579_vm11, %v1690_v38  ;;  %276 = vmatpush.msra.mxu0 %v1687_v35 }
  0x41   : > { %1356 = vmatpush.msk.msra.mxu1 %vm347_vm12, %v1688_v36  ;;  %1376 = vmatpush.msk.msra.mxu2 %vm462_vm13, %v1689_v37 }
  0x42   : > { %277 = vmatmul.f32.vlgmr.msra.gmra.mxu0 %v1781_v0  ;;  %395 = vmatmul.f32.vlgmr.msra.gmra.mxu1 %v1781_v0 }
  0x43   : > { %510 = vmatmul.f32.vlgmr.msra.gmra.mxu2 %v1781_v0  ;;  %1395 = vmatpush.msk.msra.mxu3 %vm578_vm14, %v1690_v38 }
  0x44   : > { %1565 = vset.pattern.permute.xlu2 %v1692_v3  ;;  %1566 = vset.pattern.permute.xlu0 %v1692_v3 }
  0x45   : > { %1396 = vmatpush.msk.msra.mxu3 %vm577_vm15, %v1690_v38  ;;  %1567 = vset.pattern.permute.xlu1 %v1692_v3 }
  0x46   : > { %625 = vmatmul.f32.vlgmr.msra.gmra.mxu3 %v1781_v0 }
  0xbf   : > { %v1941_v39 = vpop.f32.mrf.mxu0  ;;  %v396_v40 = vpop.f32.mrf.mxu1 }
  0xc0   : > { %346 = vst [vmem:[%s1822_s6] sm:$0xff] %v1941_v39  ;;  %v1946_v41 = vrot.slane %v1941_v39, 4  ;;  %v1949_v42 = vsub.f32 %v396_v40, %v1941_v39  ;;  %v285_v43 = vsel %vm284_vm0, %v1941_v39, 0.0 }
  0xc1   : > { %1360 = vst [vmem:[%s1822_s6 + $0x8] sm:$0xff] %v396_v40 }
  0xc2   : > { %v286_v44 = vsel %vm284_vm0, %v1946_v41, 0.0  ;;  %v1957_v46 = vrot.slane %v1949_v42, 4  ;;  %v403_v53 = vsel %vm284_vm0, %v1949_v42, 0.0 }
  0xc3   : > { %v287_v45 = vadd.f32 %v286_v44, %v285_v43 }
  0xc4   : > { %v404_v49 = vsel %vm284_vm0, %v1957_v46, 0.0 }
  0xc5   : > { %288 = vadd.xlane.f32.xlu0 %v287_v45  ;;  %v405_v56 = vadd.f32 %v404_v49, %v403_v53 }
  0xc6   : > { %v511_v47 = vpop.f32.mrf.mxu2 }
  0xc7   : > { %v1959_v48 = vsub.f32 %v511_v47, %v396_v40  ;;  %1380 = vst [vmem:[%s1822_s6 + $0x10] sm:$0xff] %v511_v47 }
  0xc9   : > { %v1965_v50 = vrot.slane %v1959_v48, 4  ;;  %v518_v51 = vsel %vm284_vm0, %v1959_v48, 0.0  ;;  %v626_v52 = vpop.f32.mrf.mxu3 }
  0xca   : > { %v1971_v54 = vsub.f32 %v626_v52, %v511_v47  ;;  %1400 = vst [vmem:[%s1822_s6 + $0x18] sm:$0xff] %v626_v52 }
  0xcb   : > { %v519_v55 = vsel %vm284_vm0, %v1965_v50, 0.0 }
  0xcc   : > { %v520_v57 = vadd.f32 %v519_v55, %v518_v51  ;;  %v1977_v58 = vrot.slane %v1971_v54, 4  ;;  %v633_v59 = vsel %vm284_vm0, %v1971_v54, 0.0 }
  0xcd   : > { %406 = vadd.xlane.f32.xlu0 %v405_v56 }
  0xce   : > { %521 = vadd.xlane.f32.xlu1 %v520_v57  ;;  %v634_v60 = vsel %vm284_vm0, %v1977_v58, 0.0 }
  0xcf   : > { %v635_v61 = vadd.f32 %v634_v60, %v633_v59 }
  0xd6   : > { %636 = vadd.xlane.f32.xlu1 %v635_v61 }
 0x138   : > { %v289_v6 = vpop.xlane.xlu0 %288 }
 0x139   : > { %v1986_v7 = vmul.f32 %v1983_v5, %v289_v6 }
 0x13b   : > { %v298_v8 = vsub.f32 %v1941_v39, %v1986_v7  ;;  %v299_v9 = vsub.f32 %v1946_v41, %v1986_v7 }
 0x13d   : > { %v300_v10 = vmul.f32 %v298_v8, %v298_v8  ;;  %v301_v11 = vmul.f32 %v299_v9, %v299_v9 }
 0x13f   : > { %v302_v12 = vsel %vm284_vm0, %v300_v10, 0.0  ;;  %v303_v13 = vsel %vm284_vm0, %v301_v11, 0.0 }
 0x140   : > { %v407_v14 = vpop.xlane.xlu0 %406  ;;  %v304_v15 = vadd.f32 %v303_v13, %v302_v12 }
 0x141   : > { %v522_v16 = vpop.xlane.xlu1 %521  ;;  %v1995_v17 = vmul.f32 %v407_v14, %v1983_v5 }
 0x142   : > { %v1998_v18 = vmul.f32 %v522_v16, %v1983_v5  ;;  %305 = vadd.xlane.f32.xlu2 %v304_v15 }
 0x143   : > { %v409_v35 = vsub.f32 %v1949_v42, %v1995_v17  ;;  %v410_v36 = vsub.f32 %v1957_v46, %v1995_v17 }
 0x144   : > { %v524_v37 = vsub.f32 %v1959_v48, %v1998_v18  ;;  %v525_v38 = vsub.f32 %v1965_v50, %v1998_v18 }
 0x145   : > { %v411_v40 = vmul.f32 %v409_v35, %v409_v35  ;;  %v412_v43 = vmul.f32 %v410_v36, %v410_v36 }
 0x146   : > { %v526_v44 = vmul.f32 %v524_v37, %v524_v37  ;;  %v527_v45 = vmul.f32 %v525_v38, %v525_v38 }
 0x147   : > { %v413_v47 = vsel %vm284_vm0, %v411_v40, 0.0  ;;  %v414_v49 = vsel %vm284_vm0, %v412_v43, 0.0 }
 0x148   : > { %v528_v51 = vsel %vm284_vm0, %v526_v44, 0.0  ;;  %v529_v52 = vsel %vm284_vm0, %v527_v45, 0.0  ;;  %v415_v53 = vadd.f32 %v414_v49, %v413_v47  ;;  %v308_v49 = vld [vmem:[%s2386_s1] sm:$0xf] }
 0x149   : > { %v637_v55 = vpop.xlane.xlu1 %636  ;;  %v530_v56 = vadd.f32 %v529_v52, %v528_v51 }
 0x14a   : > { %v2013_v57 = vmul.f32 %v637_v55, %v1983_v5  ;;  %416 = vadd.xlane.f32.xlu2 %v415_v53 }
 0x14b   : > { %531 = vadd.xlane.f32.xlu0 %v530_v56 }
 0x14c   : > { %v639_v59 = vsub.f32 %v1971_v54, %v2013_v57  ;;  %v640_v60 = vsub.f32 %v1977_v58, %v2013_v57 }
 0x14e   : > { %v641_v61 = vmul.f32 %v639_v59, %v639_v59  ;;  %v642_v62 = vmul.f32 %v640_v60, %v640_v60 }
 0x150   : > { %v643_v63 = vsel %vm284_vm0, %v641_v61, 0.0  ;;  %v644_v1 = vsel %vm284_vm0, %v642_v62, 0.0 }
 0x151   : > { %v645_v2 = vadd.f32 %v644_v1, %v643_v63 }
 0x153   : > { %646 = vadd.xlane.f32.xlu1 %v645_v2 }
 0x1b5   : > { %v306_v4 = vpop.xlane.xlu2 %305 }
 0x1b6   : > { %v307_v6 = vmul.f32 %v306_v4, %v1983_v5  ;;  %v1357_v4 = vld [vmem:[%s2386_s1 + $0x4] sm:$0xf] }
 0x1b8   : > { %v309_v8 = vadd.f32 1e-05, %v307_v6 }
 0x1ba   : > { %1570 = vrsqrt.f32 %v309_v8  ;;  %vm316_vm3 = vweird.f32 %v309_v8 }
 0x1bd   : > { %v417_v9 = vpop.xlane.xlu2 %416 }
 0x1be   : > { %v418_v10 = vmul.f32 %v417_v9, %v1983_v5  ;;  %v532_v11 = vpop.xlane.xlu0 %531 }
 0x1bf   : > { %v533_v12 = vmul.f32 %v532_v11, %v1983_v5 }
 0x1c0   : > { %v1571_v13 = vpop.eup %1570  ;;  %v421_v14 = vadd.f32 1e-05, %v418_v10 }
 0x1c1   : > { %v311_v15 = vmul.f32 %v1571_v13, %v309_v8  ;;  %v536_v16 = vadd.f32 1e-05, %v533_v12  ;;  %vm317_vm2 = vweird.f32 %v1571_v13 }
 0x1c2   : > { %1572 = vrsqrt.f32 %v421_v14  ;;  %vm318_vm4 = vmor %vm316_vm3, %vm317_vm2  ;;  %vm428_vm7 = vweird.f32 %v421_v14 }
 0x1c3   : > { %v312_v35 = vmul.f32 %v1571_v13, %v311_v15  ;;  %1574 = vrsqrt.f32 %v536_v16  ;;  %vm543_vm9 = vweird.f32 %v536_v16 }
 0x1c5   : > { %v313_v36 = vmul.f32 0.5, %v312_v35 }
 0x1c6   : > { %v647_v37 = vpop.xlane.xlu1 %646 }
 0x1c7   : > { %v314_v38 = vsub.f32 1.5, %v313_v36  ;;  %v648_v40 = vmul.f32 %v647_v37, %v1983_v5  ;;  %v321_v5 = vld [vmem:[%s2387_s2] sm:$0xf] }
 0x1c8   : > { %v1573_v43 = vpop.eup %1572 }
 0x1c9   : > { %v1575_v44 = vpop.eup %1574  ;;  %v423_v45 = vmul.f32 %v1573_v43, %v421_v14  ;;  %v651_v47 = vadd.f32 1e-05, %v648_v40  ;;  %v315_v51 = vmul.f32 %v1571_v13, %v314_v38  ;;  %vm429_vm5 = vweird.f32 %v1573_v43  ;;  %v1358_v14 = vld [vmem:[%s2387_s2 + $0x4] sm:$0xf]  ;;  %v1378_v40 = vld [vmem:[%s2387_s2 + $0x8] sm:$0xf] }
 0x1ca   : > { %v538_v52 = vmul.f32 %v1575_v44, %v536_v16  ;;  %vm544_vm6 = vweird.f32 %v1575_v44  ;;  %vm430_vm8 = vmor %vm428_vm7, %vm429_vm5 }
 0x1cb   : > { %v424_v53 = vmul.f32 %v1573_v43, %v423_v45  ;;  %1576 = vrsqrt.f32 %v651_v47  ;;  %v319_v55 = vsel %vm318_vm4, %v1571_v13, %v315_v51  ;;  %vm545_vm10 = vmor %vm543_vm9, %vm544_vm6  ;;  %vm658_vm12 = vweird.f32 %v651_v47 }
 0x1cc   : > { %v539_v56 = vmul.f32 %v1575_v44, %v538_v52  ;;  %v320_v59 = vmul.f32 %v319_v55, %v308_v49 }
 0x1cd   : > { %v425_v60 = vmul.f32 0.5, %v424_v53 }
 0x1ce   : > { %v540_v61 = vmul.f32 0.5, %v539_v56  ;;  %326 = vperm.xlu2 %1565, %v320_v59   ;;  %v322_v62 = vmul.f32 %v320_v59, %v1986_v7  ;;  %v1377_v7 = vld [vmem:[%s2386_s1 + $0x8] sm:$0xf] }
 0x1cf   : > { %v426_v63 = vsub.f32 1.5, %v425_v60 }
 0x1d0   : > { %v541_v1 = vsub.f32 1.5, %v540_v61  ;;  %v323_v2 = vsub.f32 %v321_v5, %v322_v62 }
 0x1d1   : > { %v1577_v3 = vpop.eup %1576  ;;  %v427_v6 = vmul.f32 %v1573_v43, %v426_v63 }
 0x1d2   : > { %v542_v8 = vmul.f32 %v1575_v44, %v541_v1  ;;  %v653_v9 = vmul.f32 %v1577_v3, %v651_v47  ;;  %333 = vperm.xlu0 %1566, %v323_v2   ;;  %vm659_vm11 = vweird.f32 %v1577_v3 }
 0x1d3   : > { %v431_v10 = vsel %vm430_vm8, %v1573_v43, %v427_v6  ;;  %vm660_vm13 = vmor %vm658_vm12, %vm659_vm11 }
 0x1d4   : > { %v546_v11 = vsel %vm545_vm10, %v1575_v44, %v542_v8  ;;  %v654_v12 = vmul.f32 %v1577_v3, %v653_v9  ;;  %v432_v13 = vmul.f32 %v1357_v4, %v431_v10  ;;  %v1397_v44 = vld [vmem:[%s2386_s1 + $0xc] sm:$0xf] }
 0x1d5   : > { %v547_v15 = vmul.f32 %v1377_v7, %v546_v11 }
 0x1d6   : > { %v655_v35 = vmul.f32 0.5, %v654_v12  ;;  %439 = vperm.xlu1 %1567, %v432_v13   ;;  %v435_v16 = vmul.f32 %v432_v13, %v1995_v17 }
 0x1d7   : > { %v550_v38 = vmul.f32 %v547_v15, %v1998_v18  ;;  %v1398_v18 = vld [vmem:[%s2387_s2 + $0xc] sm:$0xf] }
 0x1d8   : > { %v656_v36 = vsub.f32 1.5, %v655_v35  ;;  %v436_v37 = vsub.f32 %v1358_v14, %v435_v16 }
 0x1d9   : > { %v551_v49 = vsub.f32 %v1378_v40, %v550_v38 }
 0x1da   : > { %v657_v43 = vmul.f32 %v1577_v3, %v656_v36  ;;  %446 = vperm.xlu2 %1565, %v436_v37  }
 0x1dc   : > { %v661_v45 = vsel %vm660_vm13, %v1577_v3, %v657_v43 }
 0x1dd   : > { %v662_v17 = vmul.f32 %v1397_v44, %v661_v45 }
 0x1de   : > { %561 = vperm.xlu1 %1567, %v551_v49  }
 0x1df   : > { %v665_v51 = vmul.f32 %v662_v17, %v2013_v57 }
 0x1e1   : > { %v666_v52 = vsub.f32 %v1398_v18, %v665_v51 }
 0x1e2   : > { %554 = vperm.xlu2 %1565, %v547_v15  }
 0x1e6   : > { %676 = vperm.xlu1 %1567, %v666_v52  }
 0x1ea   : > { %669 = vperm.xlu2 %1565, %v662_v17  }
 0x228   : > { %v327_v47 = vpop.permute.xlu2 %326 }
 0x229   : > { %v329_v53 = vmul.f32 %v327_v47, %v1941_v39  ;;  %v330_v55 = vmul.f32 %v327_v47, %v1946_v41 }
 0x234   : > { %v447_v5 = vpop.permute.xlu2 %446 }
 0x23c   : > { %v555_v39 = vpop.permute.xlu2 %554 }
 0x23d   : > { %v557_v3 = vmul.f32 %v555_v39, %v1959_v48  ;;  %v558_v4 = vmul.f32 %v555_v39, %v1965_v50 }
 0x244   : > { %v334_v56 = vpop.permute.xlu0 %333 }
 0x245   : > { %v336_v59 = vadd.f32 %v334_v56, %v329_v53  ;;  %v337_v60 = vadd.f32 %v334_v56, %v330_v55 }
 0x247   : > { %340 = vst [vmem:[#allocation1] ss:$2 sm:$0xff] %v336_v59 }
 0x248   : > { %342 = vst [vmem:[#allocation1 + $0x1] ss:$2 sm:$0xff] %v337_v60  ;;  %v440_v57 = vpop.permute.xlu1 %439 }
 0x249   : > { %v442_v61 = vmul.f32 %v440_v57, %v1949_v42  ;;  %v443_v62 = vmul.f32 %v440_v57, %v1957_v46  ;;  %v670_v46 = vpop.permute.xlu2 %669 }
 0x24a   : > { %v672_v7 = vmul.f32 %v670_v46, %v1971_v54  ;;  %v673_v10 = vmul.f32 %v670_v46, %v1977_v58 }
 0x24b   : > { %v449_v1 = vadd.f32 %v447_v5, %v442_v61  ;;  %v450_v2 = vadd.f32 %v447_v5, %v443_v62 }
 0x24f   : > { %v343_v63 = vld.sshfl [vmem:[#allocation1] sm:$0xff pattern:$0x75316420] }
 0x250   : > { %345 = vst [vmem:[%s1818_s5] sm:$0xff] %v343_v63  ;;  %v562_v41 = vpop.permute.xlu1 %561 }
 0x251   : > { %453 = vst [vmem:[#allocation1] ss:$2 sm:$0xff] %v449_v1  ;;  %v564_v8 = vadd.f32 %v562_v41, %v557_v3  ;;  %v565_v42 = vadd.f32 %v562_v41, %v558_v4 }
 0x252   : > { %455 = vst [vmem:[#allocation1 + $0x1] ss:$2 sm:$0xff] %v450_v2 }
 0x258   : > { %v677_v9 = vpop.permute.xlu1 %676 }
 0x259   : > { %v456_v6 = vld.sshfl [vmem:[#allocation1] sm:$0xff pattern:$0x75316420]  ;;  %v679_v12 = vadd.f32 %v677_v9, %v672_v7  ;;  %v680_v13 = vadd.f32 %v677_v9, %v673_v10 }
 0x25a   : > { %1359 = vst [vmem:[%s1818_s5 + $0x8] sm:$0xff] %v456_v6 }
 0x25b   : > { %568 = vst [vmem:[#allocation1] ss:$2 sm:$0xff] %v564_v8 }
 0x25c   : > { %570 = vst [vmem:[#allocation1 + $0x1] ss:$2 sm:$0xff] %v565_v42 }
 0x263   : > { %v571_v11 = vld.sshfl [vmem:[#allocation1] sm:$0xff pattern:$0x75316420] }
 0x264   : > { %1379 = vst [vmem:[%s1818_s5 + $0x10] sm:$0xff] %v571_v11 }
 0x265   : > { %683 = vst [vmem:[#allocation1] ss:$2 sm:$0xff] %v679_v12 }
 0x266   : > { %685 = vst [vmem:[#allocation1 + $0x1] ss:$2 sm:$0xff] %v680_v13 }
 0x26d   : > { %v686_v48 = vld.sshfl [vmem:[#allocation1] sm:$0xff pattern:$0x75316420] }
 0x26e   : > { %1399 = vst [vmem:[%s1818_s5 + $0x18] sm:$0xff] %v686_v48 }
 0x26f PF: > { %p1401_p11 = scmp.ne.s32.totalorder %s1748_s19, 1 }
 0x271   : > { %695 = sbr.rel (%p1401_p11) target bundleno = 1225 (0x4c9), region = 40 }
 0x276   : > { %vm711_vm14 = vcmp.lt.s32.totalorder %v1814_v34, 8  ;;  %vm763_vm15 = vcmp.lt.s32.totalorder %v1814_v34, 16  ;;  %v1693_v50 = vmov 0.125   ;;  %v1694_v54 = vmov 0.0625  }
 0x277   : > { %1402 = vmatpush.msk.msra.mxu0 %vm711_vm14, %v1693_v50  ;;  %1418 = vmatpush.msk.msra.mxu1 %vm763_vm15, %v1694_v54  ;;  %vm884_vm0 = vcmp.lt.s32.totalorder %v1814_v34, 4  ;;  %vm999_vm1 = vcmp.lt.s32.totalorder %v1814_v34, 2  ;;  %v1695_v58 = vmov 0.25   ;;  %v1696_v14 = vmov 0.5  }
 0x278   : > { %1436 = vmatpush.msk.msra.mxu2 %vm884_vm0, %v1695_v58  ;;  %1456 = vmatpush.msk.msra.mxu3 %vm999_vm1, %v1696_v14  ;;  %vm710_vm2 = vcmp.lt.s32.totalorder %v1812_v33, 8  ;;  %vm762_vm3 = vcmp.lt.s32.totalorder %v1812_v33, 16  ;;  %vm883_vm4 = vcmp.lt.s32.totalorder %v1812_v33, 4  ;;  %vm998_vm5 = vcmp.lt.s32.totalorder %v1812_v33, 2 }
 0x279   : > { %1403 = vmatpush.msk.msra.mxu0 %vm710_vm2, %v1693_v50  ;;  %1419 = vmatpush.msk.msra.mxu1 %vm762_vm3, %v1694_v54  ;;  %vm709_vm6 = vcmp.lt.s32.totalorder %v1810_v32, 8  ;;  %vm761_vm7 = vcmp.lt.s32.totalorder %v1810_v32, 16  ;;  %vm882_vm8 = vcmp.lt.s32.totalorder %v1810_v32, 4  ;;  %vm997_vm9 = vcmp.lt.s32.totalorder %v1810_v32, 2 }
 0x27a   : > { %1437 = vmatpush.msk.msra.mxu2 %vm883_vm4, %v1695_v58  ;;  %1457 = vmatpush.msk.msra.mxu3 %vm998_vm5, %v1696_v14  ;;  %vm708_vm10 = vcmp.lt.s32.totalorder %v1808_v31, 8  ;;  %vm760_vm11 = vcmp.lt.s32.totalorder %v1808_v31, 16  ;;  %vm881_vm12 = vcmp.lt.s32.totalorder %v1808_v31, 4  ;;  %vm996_vm13 = vcmp.lt.s32.totalorder %v1808_v31, 2 }
 0x27b   : > { %1404 = vmatpush.msk.msra.mxu0 %vm709_vm6, %v1693_v50  ;;  %1420 = vmatpush.msk.msra.mxu1 %vm761_vm7, %v1694_v54  ;;  %vm707_vm14 = vcmp.lt.s32.totalorder %v1806_v30, 8  ;;  %vm759_vm15 = vcmp.lt.s32.totalorder %v1806_v30, 16  ;;  %vm880_vm0 = vcmp.lt.s32.totalorder %v1806_v30, 4  ;;  %vm995_vm1 = vcmp.lt.s32.totalorder %v1806_v30, 2 }
 0x27c   : > { %1438 = vmatpush.msk.msra.mxu2 %vm882_vm8, %v1695_v58  ;;  %1458 = vmatpush.msk.msra.mxu3 %vm997_vm9, %v1696_v14  ;;  %vm706_vm2 = vcmp.lt.s32.totalorder %v1804_v29, 8  ;;  %vm758_vm3 = vcmp.lt.s32.totalorder %v1804_v29, 16  ;;  %vm879_vm4 = vcmp.lt.s32.totalorder %v1804_v29, 4  ;;  %vm994_vm5 = vcmp.lt.s32.totalorder %v1804_v29, 2 }
 0x27d   : > { %1405 = vmatpush.msk.msra.mxu0 %vm708_vm10, %v1693_v50  ;;  %1421 = vmatpush.msk.msra.mxu1 %vm760_vm11, %v1694_v54  ;;  %vm705_vm6 = vcmp.lt.s32.totalorder %v1802_v28, 8  ;;  %vm757_vm7 = vcmp.lt.s32.totalorder %v1802_v28, 16  ;;  %vm878_vm8 = vcmp.lt.s32.totalorder %v1802_v28, 4  ;;  %vm993_vm9 = vcmp.lt.s32.totalorder %v1802_v28, 2 }
 0x27e   : > { %1439 = vmatpush.msk.msra.mxu2 %vm881_vm12, %v1695_v58  ;;  %1459 = vmatpush.msk.msra.mxu3 %vm996_vm13, %v1696_v14  ;;  %vm704_vm10 = vcmp.lt.s32.totalorder %v1800_v27, 8  ;;  %vm756_vm11 = vcmp.lt.s32.totalorder %v1800_v27, 16  ;;  %vm877_vm12 = vcmp.lt.s32.totalorder %v1800_v27, 4  ;;  %vm992_vm13 = vcmp.lt.s32.totalorder %v1800_v27, 2 }
 0x27f   : > { %1406 = vmatpush.msk.msra.mxu0 %vm707_vm14, %v1693_v50  ;;  %1422 = vmatpush.msk.msra.mxu1 %vm759_vm15, %v1694_v54  ;;  %vm703_vm14 = vcmp.lt.s32.totalorder %v1798_v26, 8  ;;  %vm755_vm15 = vcmp.lt.s32.totalorder %v1798_v26, 16  ;;  %v1697_v15 = vmov 1.0   ;;  %v1698_v45 = vmov 256.0  }
 0x280   : > { %1440 = vmatpush.msk.msra.mxu2 %vm880_vm0, %v1695_v58  ;;  %1460 = vmatpush.msk.msra.mxu3 %vm995_vm1, %v1696_v14  ;;  %vm876_vm0 = vcmp.lt.s32.totalorder %v1798_v26, 4  ;;  %vm991_vm1 = vcmp.lt.s32.totalorder %v1798_v26, 2  ;;  %1581 = vrcp.f32 %v1698_v45 }
 0x281   : > { %1407 = vmatpush.msk.msra.mxu0 %vm706_vm2, %v1693_v50  ;;  %1423 = vmatpush.msk.msra.mxu1 %vm758_vm3, %v1694_v54  ;;  %vm702_vm2 = vcmp.lt.s32.totalorder %v1796_v25, 8  ;;  %vm754_vm3 = vcmp.lt.s32.totalorder %v1796_v25, 16 }
 0x282   : > { %1441 = vmatpush.msk.msra.mxu2 %vm879_vm4, %v1695_v58  ;;  %1461 = vmatpush.msk.msra.mxu3 %vm994_vm5, %v1696_v14  ;;  %vm875_vm4 = vcmp.lt.s32.totalorder %v1796_v25, 4  ;;  %vm990_vm5 = vcmp.lt.s32.totalorder %v1796_v25, 2 }
 0x283   : > { %1408 = vmatpush.msk.msra.mxu0 %vm705_vm6, %v1693_v50  ;;  %1424 = vmatpush.msk.msra.mxu1 %vm757_vm7, %v1694_v54  ;;  %vm701_vm6 = vcmp.lt.s32.totalorder %v1794_v24, 8  ;;  %vm753_vm7 = vcmp.lt.s32.totalorder %v1794_v24, 16 }
 0x284   : > { %1442 = vmatpush.msk.msra.mxu2 %vm878_vm8, %v1695_v58  ;;  %1462 = vmatpush.msk.msra.mxu3 %vm993_vm9, %v1696_v14  ;;  %vm874_vm8 = vcmp.lt.s32.totalorder %v1794_v24, 4  ;;  %vm989_vm9 = vcmp.lt.s32.totalorder %v1794_v24, 2 }
 0x285   : > { %1409 = vmatpush.msk.msra.mxu0 %vm704_vm10, %v1693_v50  ;;  %1425 = vmatpush.msk.msra.mxu1 %vm756_vm11, %v1694_v54  ;;  %vm700_vm10 = vcmp.lt.s32.totalorder %v1792_v23, 8  ;;  %vm752_vm11 = vcmp.lt.s32.totalorder %v1792_v23, 16 }
 0x286   : > { %1443 = vmatpush.msk.msra.mxu2 %vm877_vm12, %v1695_v58  ;;  %1463 = vmatpush.msk.msra.mxu3 %vm992_vm13, %v1696_v14  ;;  %vm873_vm12 = vcmp.lt.s32.totalorder %v1792_v23, 4  ;;  %vm988_vm13 = vcmp.lt.s32.totalorder %v1792_v23, 2  ;;  %v1582_v49 = vpop.eup %1581 }
 0x287   : > { %1410 = vmatpush.msk.msra.mxu0 %vm703_vm14, %v1693_v50  ;;  %1426 = vmatpush.msk.msra.mxu1 %vm755_vm15, %v1694_v54  ;;  %vm699_vm14 = vcmp.lt.s32.totalorder %v1790_v22, 8  ;;  %vm751_vm15 = vcmp.lt.s32.totalorder %v1790_v22, 16  ;;  %v811_v17 = vmul.f32 256.0, %v1582_v49 }
 0x288   : > { %1444 = vmatpush.msk.msra.mxu2 %vm876_vm0, %v1695_v58  ;;  %1464 = vmatpush.msk.msra.mxu3 %vm991_vm1, %v1696_v14  ;;  %vm872_vm0 = vcmp.lt.s32.totalorder %v1790_v22, 4  ;;  %vm987_vm1 = vcmp.lt.s32.totalorder %v1790_v22, 2 }
 0x289   : > { %1411 = vmatpush.msk.msra.mxu0 %vm702_vm2, %v1693_v50  ;;  %1427 = vmatpush.msk.msra.mxu1 %vm754_vm3, %v1694_v54  ;;  %vm698_vm2 = vcmp.lt.s32.totalorder %v1788_v21, 8  ;;  %vm750_vm3 = vcmp.lt.s32.totalorder %v1788_v21, 16  ;;  %v812_v51 = vsub.f32 1.0, %v811_v17 }
 0x28a   : > { %1445 = vmatpush.msk.msra.mxu2 %vm875_vm4, %v1695_v58  ;;  %1465 = vmatpush.msk.msra.mxu3 %vm990_vm5, %v1696_v14  ;;  %vm871_vm4 = vcmp.lt.s32.totalorder %v1788_v21, 4  ;;  %vm986_vm5 = vcmp.lt.s32.totalorder %v1788_v21, 2 }
 0x28b   : > { %1412 = vmatpush.msk.msra.mxu0 %vm701_vm6, %v1693_v50  ;;  %1428 = vmatpush.msk.msra.mxu1 %vm753_vm7, %v1694_v54  ;;  %vm697_vm6 = vcmp.lt.s32.totalorder %v1786_v20, 8  ;;  %vm749_vm7 = vcmp.lt.s32.totalorder %v1786_v20, 16  ;;  %v813_v18 = vmul.f32 %v1582_v49, %v812_v51 }
 0x28c   : > { %1446 = vmatpush.msk.msra.mxu2 %vm874_vm8, %v1695_v58  ;;  %1466 = vmatpush.msk.msra.mxu3 %vm989_vm9, %v1696_v14  ;;  %vm870_vm8 = vcmp.lt.s32.totalorder %v1786_v20, 4  ;;  %vm985_vm9 = vcmp.lt.s32.totalorder %v1786_v20, 2 }
 0x28d   : > { %1413 = vmatpush.msk.msra.mxu0 %vm700_vm10, %v1693_v50  ;;  %1429 = vmatpush.msk.msra.mxu1 %vm752_vm11, %v1694_v54  ;;  %vm696_vm10 = vcmp.lt.s32.totalorder %v1784_v19, 8  ;;  %vm748_vm11 = vcmp.lt.s32.totalorder %v1784_v19, 16  ;;  %v814_v52 = vadd.f32 %v1582_v49, %v813_v18 }
 0x28e   : > { %1447 = vmatpush.msk.msra.mxu2 %vm873_vm12, %v1695_v58  ;;  %1467 = vmatpush.msk.msra.mxu3 %vm988_vm13, %v1696_v14  ;;  %vm869_vm12 = vcmp.lt.s32.totalorder %v1784_v19, 4  ;;  %vm984_vm13 = vcmp.lt.s32.totalorder %v1784_v19, 2 }
 0x28f   : > { %1414 = vmatpush.msk.msra.mxu0 %vm699_vm14, %v1693_v50  ;;  %1430 = vmatpush.msk.msra.mxu1 %vm751_vm15, %v1694_v54  ;;  %vm1114_vm14 = vcmp.lt.s32.totalorder %v1814_v34, 1  ;;  %vm1113_vm15 = vcmp.lt.s32.totalorder %v1812_v33, 1 }
 0x290   : > { %1448 = vmatpush.msk.msra.mxu2 %vm872_vm0, %v1695_v58  ;;  %1468 = vmatpush.msk.msra.mxu3 %vm987_vm1, %v1696_v14  ;;  %vm1112_vm0 = vcmp.lt.s32.totalorder %v1810_v32, 1  ;;  %vm1111_vm1 = vcmp.lt.s32.totalorder %v1808_v31, 1 }
 0x291   : > { %1415 = vmatpush.msk.msra.mxu0 %vm698_vm2, %v1693_v50  ;;  %1431 = vmatpush.msk.msra.mxu1 %vm750_vm3, %v1694_v54  ;;  %vm1110_vm2 = vcmp.lt.s32.totalorder %v1806_v30, 1  ;;  %vm1109_vm3 = vcmp.lt.s32.totalorder %v1804_v29, 1 }
 0x292   : > { %1449 = vmatpush.msk.msra.mxu2 %vm871_vm4, %v1695_v58  ;;  %1469 = vmatpush.msk.msra.mxu3 %vm986_vm5, %v1696_v14  ;;  %vm1108_vm4 = vcmp.lt.s32.totalorder %v1802_v28, 1  ;;  %vm1107_vm5 = vcmp.lt.s32.totalorder %v1800_v27, 1 }
 0x293   : > { %1416 = vmatpush.msk.msra.mxu0 %vm697_vm6, %v1693_v50  ;;  %1432 = vmatpush.msk.msra.mxu1 %vm749_vm7, %v1694_v54  ;;  %vm1106_vm6 = vcmp.lt.s32.totalorder %v1798_v26, 1  ;;  %vm1105_vm7 = vcmp.lt.s32.totalorder %v1796_v25, 1 }
 0x294   : > { %1450 = vmatpush.msk.msra.mxu2 %vm870_vm8, %v1695_v58  ;;  %1470 = vmatpush.msk.msra.mxu3 %vm985_vm9, %v1696_v14  ;;  %vm1104_vm8 = vcmp.lt.s32.totalorder %v1794_v24, 1  ;;  %vm1103_vm9 = vcmp.lt.s32.totalorder %v1792_v23, 1 }
 0x295   : > { %1417 = vmatpush.msk.msra.mxu0 %vm696_vm10, %v1693_v50  ;;  %1433 = vmatpush.msk.msra.mxu1 %vm748_vm11, %v1694_v54  ;;  %vm1102_vm10 = vcmp.lt.s32.totalorder %v1790_v22, 1  ;;  %vm1101_vm11 = vcmp.lt.s32.totalorder %v1788_v21, 1 }
 0x296   : > { %1451 = vmatpush.msk.msra.mxu2 %vm869_vm12, %v1695_v58  ;;  %1471 = vmatpush.msk.msra.mxu3 %vm984_vm13, %v1696_v14  ;;  %vm1100_vm12 = vcmp.lt.s32.totalorder %v1786_v20, 1  ;;  %vm1099_vm13 = vcmp.lt.s32.totalorder %v1784_v19, 1 }
 0x297   : > { %744 = vmatmul.f32.vlgmr.msra.gmra.mxu0 %v1781_v0  ;;  %796 = vmatmul.f32.vlgmr.msra.gmra.mxu1 %v1781_v0 }
 0x298   : > { %917 = vmatmul.f32.vlgmr.msra.gmra.mxu2 %v1781_v0  ;;  %1032 = vmatmul.f32.vlgmr.msra.gmra.mxu3 %v1781_v0 }
 0x299   : > { %1476 = vmatpush.msk.msrb.mxu0 %vm1114_vm14, %v1697_v15  ;;  %vm804_vm14 = vcmask 1043456  }
 0x29b   : > { %1477 = vmatpush.msk.msrb.mxu0 %vm1113_vm15, %v1697_v15  ;;  %vm815_vm15 = vweird.f32 %v1582_v49 }
 0x29c   : > { %v2255_v47 = vsel %vm815_vm15, %v1582_v49, %v814_v52 }
 0x29d   : > { %1478 = vmatpush.msk.msrb.mxu0 %vm1112_vm0, %v1697_v15 }
 0x29f   : > { %1479 = vmatpush.msk.msrb.mxu0 %vm1111_vm1, %v1697_v15 }
 0x2a1   : > { %1480 = vmatpush.msk.msrb.mxu0 %vm1110_vm2, %v1697_v15 }
 0x2a3   : > { %1481 = vmatpush.msk.msrb.mxu0 %vm1109_vm3, %v1697_v15 }
 0x2a5   : > { %1482 = vmatpush.msk.msrb.mxu0 %vm1108_vm4, %v1697_v15 }
 0x2a7   : > { %1483 = vmatpush.msk.msrb.mxu0 %vm1107_vm5, %v1697_v15 }
 0x2a9   : > { %1484 = vmatpush.msk.msrb.mxu0 %vm1106_vm6, %v1697_v15 }
 0x2ab   : > { %1485 = vmatpush.msk.msrb.mxu0 %vm1105_vm7, %v1697_v15 }
 0x2ad   : > { %1486 = vmatpush.msk.msrb.mxu0 %vm1104_vm8, %v1697_v15 }
 0x2af   : > { %1487 = vmatpush.msk.msrb.mxu0 %vm1103_vm9, %v1697_v15 }
 0x2b1   : > { %1488 = vmatpush.msk.msrb.mxu0 %vm1102_vm10, %v1697_v15 }
 0x2b3   : > { %1489 = vmatpush.msk.msrb.mxu0 %vm1101_vm11, %v1697_v15 }
 0x2b5   : > { %1490 = vmatpush.msk.msrb.mxu0 %vm1100_vm12, %v1697_v15 }
 0x2b7   : > { %1491 = vmatpush.msk.msrb.mxu0 %vm1099_vm13, %v1697_v15 }
 0x2b8   : > { %1147 = vmatmul.f32.vlgmr.msrb.gmra.mxu0 %v1781_v0 }
 0x314   : > { %v745_v24 = vpop.f32.mrf.mxu0  ;;  %v797_v23 = vpop.f32.mrf.mxu1 }
 0x315   : > { %868 = vst [vmem:[%s1822_s6] sm:$0xff] %v745_v24  ;;  %v2216_v22 = vsub.f32 %v745_v24, %v797_v23 }
 0x317   : > { %v2219_v21 = vrot.slane %v2216_v22, 4  ;;  %v805_v20 = vsel %vm804_vm14, %v2216_v22, 0.0 }
 0x319   : > { %v806_v19 = vsel %vm804_vm14, %v2219_v21, 0.0 }
 0x31a   : > { %v807_v25 = vadd.f32 %v806_v19, %v805_v20 }
 0x31b   : > { %v918_v26 = vpop.f32.mrf.mxu2  ;;  %v1033_v27 = vpop.f32.mrf.mxu3 }
 0x31c   : > { %v2225_v0 = vsub.f32 %v918_v26, %v745_v24  ;;  %1455 = vst [vmem:[%s1822_s6 + $0x8] sm:$0xff] %v918_v26  ;;  %v2228_v28 = vsub.f32 %v1033_v27, %v918_v26  ;;  %808 = vadd.xlane.f32.xlu0 %v807_v25  ;;  %v1699_v25 = vmov 0  }
 0x31d   : > { %1475 = vst [vmem:[%s1822_s6 + $0x10] sm:$0xff] %v1033_v27  ;;  %1578 = vset.pattern.permute.xlu2 %v1699_v25  ;;  %1579 = vset.pattern.permute.xlu0 %v1699_v25 }
 0x31e   : > { %v2232_v29 = vrot.slane %v2228_v28, 4  ;;  %v1040_v30 = vsel %vm804_vm14, %v2228_v28, 0.0  ;;  %v2237_v31 = vrot.slane %v2225_v0, 4  ;;  %v925_v32 = vsel %vm804_vm14, %v2225_v0, 0.0  ;;  %1580 = vset.pattern.permute.xlu1 %v1699_v25 }
 0x320   : > { %v1041_v33 = vsel %vm804_vm14, %v2232_v29, 0.0  ;;  %v926_v34 = vsel %vm804_vm14, %v2237_v31, 0.0 }
 0x321   : > { %v1042_v35 = vadd.f32 %v1041_v33, %v1040_v30  ;;  %v927_v16 = vadd.f32 %v926_v34, %v925_v32 }
 0x323   : > { %1043 = vadd.xlane.f32.xlu1 %v1042_v35 }
 0x324   : > { %928 = vadd.xlane.f32.xlu0 %v927_v16 }
 0x335   : > { %v1148_v36 = vpop.f32.mrf.mxu0 }
 0x336   : > { %v2245_v37 = vsub.f32 %v1148_v36, %v1033_v27  ;;  %1495 = vst [vmem:[%s1822_s6 + $0x18] sm:$0xff] %v1148_v36 }
 0x338   : > { %v2249_v38 = vrot.slane %v2245_v37, 4  ;;  %v1155_v40 = vsel %vm804_vm14, %v2245_v37, 0.0 }
 0x33a   : > { %v1156_v43 = vsel %vm804_vm14, %v2249_v38, 0.0 }
 0x33b   : > { %v1157_v44 = vadd.f32 %v1156_v43, %v1155_v40 }
 0x33d   : > { %1158 = vadd.xlane.f32.xlu1 %v1157_v44 }
 0x38f   : > { %v809_v53 = vpop.xlane.xlu0 %808 }
 0x390   : > { %v2258_v55 = vmul.f32 %v2255_v47, %v809_v53  ;;  %v1434_v53 = vld [vmem:[%s2386_s1 + $0x10] sm:$0xf] }
 0x392   : > { %v818_v56 = vsub.f32 %v2216_v22, %v2258_v55  ;;  %v819_v59 = vsub.f32 %v2219_v21, %v2258_v55 }
 0x394   : > { %v820_v60 = vmul.f32 %v818_v56, %v818_v56  ;;  %v821_v57 = vmul.f32 %v819_v59, %v819_v59 }
 0x396   : > { %v1044_v5 = vpop.xlane.xlu1 %1043  ;;  %v822_v61 = vsel %vm804_vm14, %v820_v60, 0.0  ;;  %v823_v62 = vsel %vm804_vm14, %v821_v57, 0.0 }
 0x397   : > { %v2267_v63 = vmul.f32 %v1044_v5, %v2255_v47  ;;  %v929_v1 = vpop.xlane.xlu0 %928  ;;  %v824_v2 = vadd.f32 %v823_v62, %v822_v61 }
 0x398   : > { %v2270_v39 = vmul.f32 %v929_v1, %v2255_v47  ;;  %v1435_v1 = vld [vmem:[%s2387_s2 + $0x10] sm:$0xf] }
 0x399   : > { %825 = vadd.xlane.f32.xlu2 %v824_v2  ;;  %v1046_v41 = vsub.f32 %v2228_v28, %v2267_v63  ;;  %v1047_v3 = vsub.f32 %v2232_v29, %v2267_v63 }
 0x39a   : > { %v931_v4 = vsub.f32 %v2225_v0, %v2270_v39  ;;  %v932_v6 = vsub.f32 %v2237_v31, %v2270_v39 }
 0x39b   : > { %v1048_v8 = vmul.f32 %v1046_v41, %v1046_v41  ;;  %v1049_v42 = vmul.f32 %v1047_v3, %v1047_v3 }
 0x39c   : > { %v933_v46 = vmul.f32 %v931_v4, %v931_v4  ;;  %v934_v9 = vmul.f32 %v932_v6, %v932_v6 }
 0x39d   : > { %v1050_v7 = vsel %vm804_vm14, %v1048_v8, 0.0  ;;  %v1051_v10 = vsel %vm804_vm14, %v1049_v42, 0.0  ;;  %v1452_v8 = vld [vmem:[%s2386_s1 + $0x14] sm:$0xf] }
 0x39e   : > { %v1052_v11 = vadd.f32 %v1051_v10, %v1050_v7  ;;  %v935_v12 = vsel %vm804_vm14, %v933_v46, 0.0  ;;  %v936_v13 = vsel %vm804_vm14, %v934_v9, 0.0  ;;  %v1472_v46 = vld [vmem:[%s2386_s1 + $0x18] sm:$0xf] }
 0x39f   : > { %v937_v48 = vadd.f32 %v936_v13, %v935_v12 }
 0x3a0   : > { %1053 = vadd.xlane.f32.xlu0 %v1052_v11  ;;  %v1453_v11 = vld [vmem:[%s2387_s2 + $0x14] sm:$0xf] }
 0x3a1   : > { %938 = vadd.xlane.f32.xlu2 %v937_v48 }
 0x3b0   : > { %v1159_v50 = vpop.xlane.xlu1 %1158 }
 0x3b1   : > { %v2285_v54 = vmul.f32 %v1159_v50, %v2255_v47 }
 0x3b3   : > { %v1161_v58 = vsub.f32 %v2245_v37, %v2285_v54  ;;  %v1162_v14 = vsub.f32 %v2249_v38, %v2285_v54 }
 0x3b5   : > { %v1163_v15 = vmul.f32 %v1161_v58, %v1161_v58  ;;  %v1164_v24 = vmul.f32 %v1162_v14, %v1162_v14 }
 0x3b7   : > { %v1165_v23 = vsel %vm804_vm14, %v1163_v15, 0.0  ;;  %v1166_v20 = vsel %vm804_vm14, %v1164_v24, 0.0  ;;  %v1473_v15 = vld [vmem:[%s2387_s2 + $0x18] sm:$0xf] }
 0x3b8   : > { %v1167_v19 = vadd.f32 %v1166_v20, %v1165_v23 }
 0x3ba   : > { %1168 = vadd.xlane.f32.xlu1 %v1167_v19 }
 0x40c   : > { %v826_v26 = vpop.xlane.xlu2 %825 }
 0x40d   : > { %v827_v27 = vmul.f32 %v826_v26, %v2255_v47 }
 0x40f   : > { %v830_v30 = vadd.f32 1e-05, %v827_v27 }
 0x411   : > { %1583 = vrsqrt.f32 %v830_v30  ;;  %vm837_vm1 = vweird.f32 %v830_v30 }
 0x413   : > { %v1054_v32 = vpop.xlane.xlu0 %1053 }
 0x414   : > { %v1055_v33 = vmul.f32 %v1054_v32, %v2255_v47  ;;  %v939_v34 = vpop.xlane.xlu2 %938 }
 0x415   : > { %v940_v35 = vmul.f32 %v939_v34, %v2255_v47 }
 0x416   : > { %v1058_v16 = vadd.f32 1e-05, %v1055_v33 }
 0x417   : > { %v1584_v36 = vpop.eup %1583  ;;  %v943_v40 = vadd.f32 1e-05, %v940_v35 }
 0x418   : > { %v832_v43 = vmul.f32 %v1584_v36, %v830_v30  ;;  %1585 = vrsqrt.f32 %v1058_v16  ;;  %vm838_vm0 = vweird.f32 %v1584_v36  ;;  %vm1065_vm5 = vweird.f32 %v1058_v16  ;;  %v1493_v30 = vld [vmem:[%s2387_s2 + $0x1c] sm:$0xf] }
 0x419   : > { %1587 = vrsqrt.f32 %v943_v40  ;;  %vm839_vm2 = vmor %vm837_vm1, %vm838_vm0  ;;  %vm950_vm7 = vweird.f32 %v943_v40 }
 0x41a   : > { %v833_v44 = vmul.f32 %v1584_v36, %v832_v43 }
 0x41c   : > { %v834_v45 = vmul.f32 0.5, %v833_v44 }
 0x41e   : > { %v1586_v49 = vpop.eup %1585  ;;  %v835_v17 = vsub.f32 1.5, %v834_v45 }
 0x41f   : > { %v1588_v51 = vpop.eup %1587  ;;  %v1060_v18 = vmul.f32 %v1586_v49, %v1058_v16  ;;  %vm1066_vm3 = vweird.f32 %v1586_v49 }
 0x420   : > { %v945_v52 = vmul.f32 %v1588_v51, %v943_v40  ;;  %v836_v56 = vmul.f32 %v1584_v36, %v835_v17  ;;  %vm951_vm4 = vweird.f32 %v1588_v51  ;;  %vm1067_vm6 = vmor %vm1065_vm5, %vm1066_vm3 }
 0x421   : > { %v1061_v59 = vmul.f32 %v1586_v49, %v1060_v18  ;;  %vm952_vm8 = vmor %vm950_vm7, %vm951_vm4 }
 0x422   : > { %v946_v60 = vmul.f32 %v1588_v51, %v945_v52  ;;  %v840_v57 = vsel %vm839_vm2, %v1584_v36, %v836_v56 }
 0x423   : > { %v1062_v5 = vmul.f32 0.5, %v1061_v59  ;;  %v841_v61 = vmul.f32 %v1434_v53, %v840_v57 }
 0x424   : > { %v947_v62 = vmul.f32 0.5, %v946_v60 }
 0x425   : > { %v1063_v2 = vsub.f32 1.5, %v1062_v5  ;;  %848 = vperm.xlu2 %1578, %v841_v61   ;;  %v844_v41 = vmul.f32 %v841_v61, %v2258_v55 }
 0x426   : > { %v948_v3 = vsub.f32 1.5, %v947_v62 }
 0x427   : > { %v1064_v4 = vmul.f32 %v1586_v49, %v1063_v2  ;;  %v845_v6 = vsub.f32 %v1435_v1, %v844_v41 }
 0x428   : > { %v949_v42 = vmul.f32 %v1588_v51, %v948_v3 }
 0x429   : > { %v1068_v9 = vsel %vm1067_vm6, %v1586_v49, %v1064_v4  ;;  %855 = vperm.xlu0 %1579, %v845_v6  }
 0x42a   : > { %v953_v55 = vsel %vm952_vm8, %v1588_v51, %v949_v42  ;;  %v1069_v10 = vmul.f32 %v1472_v46, %v1068_v9 }
 0x42b   : > { %v954_v7 = vmul.f32 %v1452_v8, %v953_v55 }
 0x42c   : > { %v1072_v58 = vmul.f32 %v1069_v10, %v2267_v63 }
 0x42d   : > { %v1169_v12 = vpop.xlane.xlu1 %1168  ;;  %961 = vperm.xlu1 %1580, %v954_v7   ;;  %v957_v13 = vmul.f32 %v954_v7, %v2270_v39 }
 0x42e   : > { %v1170_v48 = vmul.f32 %v1169_v12, %v2255_v47  ;;  %v1073_v24 = vsub.f32 %v1473_v15, %v1072_v58  ;;  %v1492_v47 = vld [vmem:[%s2386_s1 + $0x1c] sm:$0xf] }
 0x42f   : > { %v958_v50 = vsub.f32 %v1453_v11, %v957_v13 }
 0x430   : > { %v1173_v14 = vadd.f32 1e-05, %v1170_v48 }
 0x431   : > { %968 = vperm.xlu2 %1578, %v958_v50  }
 0x432   : > { %1589 = vrsqrt.f32 %v1173_v14  ;;  %vm1180_vm10 = vweird.f32 %v1173_v14 }
 0x435   : > { %1083 = vperm.xlu1 %1580, %v1073_v24  }
 0x438   : > { %v1590_v23 = vpop.eup %1589 }
 0x439   : > { %v1175_v20 = vmul.f32 %v1590_v23, %v1173_v14  ;;  %1076 = vperm.xlu2 %1578, %v1069_v10   ;;  %vm1181_vm9 = vweird.f32 %v1590_v23 }
 0x43a   : > { %vm1182_vm11 = vmor %vm1180_vm10, %vm1181_vm9 }
 0x43b   : > { %v1176_v19 = vmul.f32 %v1590_v23, %v1175_v20 }
 0x43d   : > { %v1177_v25 = vmul.f32 0.5, %v1176_v19 }
 0x43f   : > { %v1178_v39 = vsub.f32 1.5, %v1177_v25 }
 0x441   : > { %v1179_v63 = vmul.f32 %v1590_v23, %v1178_v39 }
 0x443   : > { %v1183_v26 = vsel %vm1182_vm11, %v1590_v23, %v1179_v63 }
 0x444   : > { %v1184_v27 = vmul.f32 %v1492_v47, %v1183_v26 }
 0x446   : > { %1191 = vperm.xlu2 %1578, %v1184_v27   ;;  %v1187_v32 = vmul.f32 %v1184_v27, %v2285_v54 }
 0x448   : > { %v1188_v33 = vsub.f32 %v1493_v30, %v1187_v32 }
 0x44a   : > { %1198 = vperm.xlu1 %1580, %v1188_v33  }
 0x47f   : > { %v849_v34 = vpop.permute.xlu2 %848 }
 0x480   : > { %v851_v35 = vmul.f32 %v849_v34, %v2216_v22  ;;  %v852_v16 = vmul.f32 %v849_v34, %v2219_v21 }
 0x48b   : > { %v969_v45 = vpop.permute.xlu2 %968 }
 0x493   : > { %v1077_v22 = vpop.permute.xlu2 %1076 }
 0x494   : > { %v1079_v52 = vmul.f32 %v1077_v22, %v2228_v28  ;;  %v1080_v53 = vmul.f32 %v1077_v22, %v2232_v29 }
 0x49b   : > { %v856_v36 = vpop.permute.xlu0 %855 }
 0x49c   : > { %v858_v40 = vadd.f32 %v856_v36, %v851_v35  ;;  %v859_v43 = vadd.f32 %v856_v36, %v852_v16 }
 0x49e   : > { %862 = vst [vmem:[#allocation1] ss:$2 sm:$0xff] %v858_v40 }
 0x49f   : > { %864 = vst [vmem:[#allocation1 + $0x1] ss:$2 sm:$0xff] %v859_v43  ;;  %v962_v44 = vpop.permute.xlu1 %961 }
 0x4a0   : > { %v964_v49 = vmul.f32 %v962_v44, %v2225_v0  ;;  %v965_v54 = vmul.f32 %v962_v44, %v2237_v31  ;;  %v1192_v31 = vpop.permute.xlu2 %1191 }
 0x4a1   : > { %v1194_v57 = vmul.f32 %v1192_v31, %v2245_v37  ;;  %v1195_v5 = vmul.f32 %v1192_v31, %v2249_v38 }
 0x4a2   : > { %v971_v51 = vadd.f32 %v969_v45, %v964_v49  ;;  %v972_v18 = vadd.f32 %v969_v45, %v965_v54 }
 0x4a6   : > { %v865_v17 = vld.sshfl [vmem:[#allocation1] sm:$0xff pattern:$0x75316420] }
 0x4a7   : > { %867 = vst [vmem:[%s1818_s5] sm:$0xff] %v865_v17  ;;  %v1084_v21 = vpop.permute.xlu1 %1083 }
 0x4a8   : > { %975 = vst [vmem:[#allocation1] ss:$2 sm:$0xff] %v971_v51  ;;  %v1086_v59 = vadd.f32 %v1084_v21, %v1079_v52  ;;  %v1087_v0 = vadd.f32 %v1084_v21, %v1080_v53 }
 0x4a9   : > { %977 = vst [vmem:[#allocation1 + $0x1] ss:$2 sm:$0xff] %v972_v18 }
 0x4b0   : > { %v978_v56 = vld.sshfl [vmem:[#allocation1] sm:$0xff pattern:$0x75316420] }
 0x4b1   : > { %1454 = vst [vmem:[%s1818_s5 + $0x8] sm:$0xff] %v978_v56 }
 0x4b2   : > { %1090 = vst [vmem:[#allocation1] ss:$2 sm:$0xff] %v1086_v59 }
 0x4b3   : > { %1092 = vst [vmem:[#allocation1 + $0x1] ss:$2 sm:$0xff] %v1087_v0 }
 0x4ba   : > { %v1093_v60 = vld.sshfl [vmem:[#allocation1] sm:$0xff pattern:$0x75316420] }
 0x4bb   : > { %1474 = vst [vmem:[%s1818_s5 + $0x10] sm:$0xff] %v1093_v60 }
 0x4bc   : > { %v1199_v61 = vpop.permute.xlu1 %1198 }
 0x4bd   : > { %v1201_v62 = vadd.f32 %v1199_v61, %v1194_v57  ;;  %v1202_v1 = vadd.f32 %v1199_v61, %v1195_v5 }
 0x4bf   : > { %1205 = vst [vmem:[#allocation1] ss:$2 sm:$0xff] %v1201_v62 }
 0x4c0   : > { %1207 = vst [vmem:[#allocation1 + $0x1] ss:$2 sm:$0xff] %v1202_v1 }
 0x4c7   : > { %v1208_v28 = vld.sshfl [vmem:[#allocation1] sm:$0xff pattern:$0x75316420] }
 0x4c8   : > { %1494 = vst [vmem:[%s1818_s5 + $0x18] sm:$0xff] %v1208_v28 }
 0x4c9 PF: > { %s1504_s11 = sshll.u32 %s1748_s19, 5  ;;  %s1232_s20 = sshll.u32 %s1818_s5, 4  ;;  %s1233_s20 = int_to_ptr.vmem [resolvable:$true] %s1232_s20 }
 0x4ca   : > { %s1231_s14 = scalar_lea.hbm %s2388_s3, %s1504_s11  ;;  %s1215_s23 = scalar_lea.sflag [#allocation3], %s1776_s27 }
 0x4cb   : > { %s1234_s22 = sshll.u32 %s1231_s14, 4  ;;  %s1611_s19 = scalar_lea.hbm %s2388_s3, 64  ;;  %s1235_s22 = int_to_ptr.hbm [resolvable:$true] %s1234_s22 }
 0x4cc   : > { %s1605_s28 = sshra.s32 %s1235_s22, 4  ;;  %s1606_s28 = int_to_ptr.hbm [resolvable:$true] %s1605_s28 }
 0x4cd   : > { %s1607_s29 = scalar_lea.hbm %s1606_s28, 32  ;;  %p1612_p1 = scmp.lt.s32.totalorder %s1606_s28, %s2388_s3 }
 0x4ce   : > { %p1608_p12 = scmp.ne.s32.totalorder %s1606_s28, %s1607_s29  ;;  %p1613_p2 = scmp.lt.s32.totalorder %s1611_s19, %s1607_s29 }
 0x4d0   : > { %p1609_p13 = pnand %p1608_p12, %p1765_p5  ;;  %p1614_p3 = por %p1613_p2, %p1612_p1 }
 0x4d2   : > { %p1610_p0 = pneg %p1609_p13 }
 0x4d4   : > { %p1615_p4 = pnand %p1614_p3, %p1610_p0 }
 0x4d6   : > { %1618 = shalt.err (!%p1615_p4)
}
 0x4d7   : > { %s1700_s5 = smov 128   ;;  %s1701_s10 = smov 8  }
 0x4d8   : > { %1506 = dma.vmem_to_hbm [thread:$0]  (%p1765_p5), %s1233_s20, 512, %s1235_s22, %s1215_s23, %s1700_s5, %s1700_s5, %s1701_s10  }
 0x4d9   : > { %s1248_s14 = scalar_lea.hbm %s2389_s4, %s1504_s11  ;;  %s1249_s30 = sshll.u32 %s1822_s6, 4  ;;  %s1250_s30 = int_to_ptr.vmem [resolvable:$true] %s1249_s30 }
 0x4da   : > { %s1251_s7 = sshll.u32 %s1248_s14, 4  ;;  %s1220_s28 = scalar_lea.sflag [#allocation5], %s1776_s27  ;;  %s1252_s7 = int_to_ptr.hbm [resolvable:$true] %s1251_s7 }
 0x4db   : > { %s1633_s29 = sshra.s32 %s1252_s7, 4  ;;  %s1639_s20 = scalar_lea.hbm %s2389_s4, 64  ;;  %s1634_s29 = int_to_ptr.hbm [resolvable:$true] %s1633_s29 }
 0x4dc   : > { %s1635_s19 = scalar_lea.hbm %s1634_s29, 32  ;;  %p1640_p10 = scmp.lt.s32.totalorder %s1634_s29, %s2389_s4 }
 0x4dd   : > { %p1636_p7 = scmp.ne.s32.totalorder %s1634_s29, %s1635_s19  ;;  %p1641_p11 = scmp.lt.s32.totalorder %s1639_s20, %s1635_s19 }
 0x4df   : > { %p1637_p8 = pnand %p1636_p7, %p1765_p5  ;;  %p1642_p12 = por %p1641_p11, %p1640_p10 }
 0x4e1   : > { %p1638_p9 = pneg %p1637_p8 }
 0x4e3   : > { %p1643_p13 = pnand %p1642_p12, %p1638_p9 }
 0x4e5   : > { %1646 = shalt.err (!%p1643_p13)
}
 0x4e6   : > { %1507 = dma.vmem_to_hbm [thread:$0]  (%p1765_p5), %s1250_s30, 512, %s1252_s7, %s1220_s28, %s1700_s5, %s1700_s5, %s1701_s10  }
 0x4e7 PF: > { %p1517_p0 = scmp.ge.s32.totalorder %s1685_s18, 2  ;;  %s1266_s27 = sand.u32 1, %s1673_s15  }
 0x4e8   : > { %s1267_s6 = scalar_lea.sflag [#allocation3], %s1266_s27 }
 0x4e9   : > { %p1511_p1 = pnand %p1517_p0, %p1769_p6 }
 0x4eb   : > { %p1512_p2 = pneg %p1511_p1 }
 0x4ed   : > { %1664 = dma.done.wait (%p1512_p2), %s1267_s6, 512  }
 0x4ee   : > { %1666 = vsyncadd (%p1512_p2), %s1267_s6, 4294966784  ;;  %s1277_s11 = scalar_lea.sflag [#allocation5], %s1266_s27 }
 0x4ef   : > { %1668 = dma.done.wait (%p1512_p2), %s1277_s11, 512  }
 0x4f0   : > { %1670 = vsyncadd (%p1512_p2), %s1277_s11, 4294966784  ;;  %p18_p5 = scmp.ge.s32.totalorder %s1752_s21, 4   ;;  %s2392_s15 = smov %s1677_s16 }
 0x4f1   : > { %s2393_s16 = smov %s1681_s17  ;;  %s2394_s17 = smov %s1763_s24 }
 0x4f2   : > { %s2395_s18 = smov %s1752_s21  ;;  %20 = sbr.rel (!%p18_p5) target bundleno = 5 (0x5), region = 123 }
 0x4f7   :  { %1283 = vsyncpa [#allocation3], 1 }
 0x4f8   :  { %1285 = vsyncpa [#allocation3 + $0x1], 1 }
 0x4f9   :  { %1286 = vsyncpa [#allocation5], 1 }
 0x4fa   :  { %1288 = vsyncpa [#allocation5 + $0x1], 1 }

</bundles_post_ra>
